<compile_context>
chip_gen: v6e
topology: v6e:2x2x1
jax: 0.10.0
libtpu: 0.0.40
codegen_flags: <defaults>
</compile_context>

<pallas_src>
import jax
import jax.numpy as jnp
from jax.experimental import pallas as pl
from jax.experimental.pallas import tpu as pltpu

# Module hyper-parameters (small spatial size per instructions; the MLP
# structure matches the PyTorch module exactly).
LATENT_DIM = 100
TEXT_DIM = 512
IMAGE_SIZE = 16                      # scaled-down spatial size (spec uses 64)
H1 = 256
H2 = 512
OUT_DIM = 3 * IMAGE_SIZE * IMAGE_SIZE  # 768, multiple of 128 -> lane-dense vst

LATENT_PAD = 128                     # pad latent contraction dim to one lane group


def _generator_kernel(xn_ref, xt_ref, w1a_ref, w1b_ref, b1_ref,
                      w2_ref, b2_ref, w3_ref, b3_ref, o_ref):
    """Fused 3-layer MLP on one batch tile; bf16 operands, f32 accumulation."""
    # Layer 1: concat folded into two dots (xn @ W1a + xt @ W1b).
    h1 = jnp.dot(xn_ref[...], w1a_ref[...], preferred_element_type=jnp.float32)
    h1 = h1 + jnp.dot(xt_ref[...], w1b_ref[...],
                      preferred_element_type=jnp.float32)
    h1 = jnp.maximum(h1 + b1_ref[...], 0.0)
    # Layer 2.
    h2 = jnp.dot(h1.astype(jnp.bfloat16), w2_ref[...],
                 preferred_element_type=jnp.float32)
    h2 = jnp.maximum(h2 + b2_ref[...], 0.0)
    # Layer 3 + tanh (EUP).
    h3 = jnp.dot(h2.astype(jnp.bfloat16), w3_ref[...],
                 preferred_element_type=jnp.float32)
    o_ref[...] = jnp.tanh(h3 + b3_ref[...])


def prepare_params(params):
    """One-time param prep (outside the per-call path):
    split/pad W1, cast weights to bf16, reshape biases to (1, N) f32 rows."""
    w1, b1, w2, b2, w3, b3 = params
    w1a = jnp.pad(w1[:LATENT_DIM], ((0, LATENT_PAD - LATENT_DIM), (0, 0)))
    w1a = w1a.astype(jnp.bfloat16)                       # (128, 256)
    w1b = w1[LATENT_DIM:].astype(jnp.bfloat16)           # (512, 256)
    w2b = w2.astype(jnp.bfloat16)                        # (256, 512)
    w3b = w3.astype(jnp.bfloat16)                        # (512, 768)
    b1r = b1.reshape(1, H1).astype(jnp.float32)
    b2r = b2.reshape(1, H2).astype(jnp.float32)
    b3r = b3.reshape(1, OUT_DIM).astype(jnp.float32)
    return (w1a, w1b, b1r, w2b, b2r, w3b, b3r)


def _round_up(x, m):
    return ((x + m - 1) // m) * m


@jax.jit
def generator_forward(noise, text_embedding, prep):
    """noise: (B, LATENT_DIM), text_embedding: (B, TEXT_DIM) -> (B, 3, H, W)."""
    w1a, w1b, b1r, w2b, b2r, w3b, b3r = prep
    b = noise.shape[0]

    # Batch tile: one right-sized tile (rounded up to 8 sublanes) when the
    # whole batch fits in <=128 rows; otherwise 128-row tiles so the MXU is
    # fed properly and the batch axis pipelines / shards across cores.
    tm = _round_up(b, 8) if b <= 128 else 128
    b_pad = _round_up(b, tm)
    grid = (b_pad // tm,)

    # Only tiny per-call pads remain (zero-padded latent lanes hit zero weight
    # rows in W1a, zero-padded batch rows are sliced off below).
    xn = jnp.pad(noise, ((0, b_pad - b), (0, LATENT_PAD - LATENT_DIM)))
    xn = xn.astype(jnp.bfloat16)
    xt = jnp.pad(text_embedding, ((0, b_pad - b), (0, 0))).astype(jnp.bfloat16)

    batch_spec = lambda cols: pl.BlockSpec((tm, cols), lambda i: (i, 0))
    const_spec = lambda shape: pl.BlockSpec(shape, lambda i: (0, 0))

    out_flat = pl.pallas_call(
        _generator_kernel,
        out_shape=jax.ShapeDtypeStruct((b_pad, OUT_DIM), jnp.float32),
        grid=grid,
        in_specs=[
            batch_spec(LATENT_PAD),            # xn
            batch_spec(TEXT_DIM),              # xt
            const_spec((LATENT_PAD, H1)),      # w1a
            const_spec((TEXT_DIM, H1)),        # w1b
            const_spec((1, H1)),               # b1
            const_spec((H1, H2)),              # w2
            const_spec((1, H2)),               # b2
            const_spec((H2, OUT_DIM)),         # w3
            const_spec((1, OUT_DIM)),          # b3
        ],
        out_specs=batch_spec(OUT_DIM),
        compiler_params=pltpu.CompilerParams(
            dimension_semantics=("parallel",),
            vmem_limit_bytes=8 << 20,
        ),
    )(xn, xt, w1a, w1b, b1r, w2b, b2r, w3b, b3r)

    out = out_flat[:b]
    return out.reshape(b, 3, IMAGE_SIZE, IMAGE_SIZE)


def init_params(key):
    """Deterministic init matching nn.Linear shapes (stored as (in, out))."""
    ks = jax.random.split(key, 6)

    def linear(kw, kb, fan_in, fan_out):
        bound = 1.0 / jnp.sqrt(fan_in)
        w = jax.random.uniform(kw, (fan_in, fan_out), jnp.float32, -bound, bound)
        b = jax.random.uniform(kb, (fan_out,), jnp.float32, -bound, bound)
        return w, b

    w1, b1 = linear(ks[0], ks[1], LATENT_DIM + TEXT_DIM, H1)
    w2, b2 = linear(ks[2], ks[3], H1, H2)
    w3, b3 = linear(ks[4], ks[5], H2, OUT_DIM)
    return (w1, b1, w2, b2, w3, b3)


def reference_forward(noise, text_embedding, params):
    w1, b1, w2, b2, w3, b3 = params
    x = jnp.concatenate([noise, text_embedding], axis=1)
    x = jnp.maximum(x @ w1 + b1, 0.0)
    x = jnp.maximum(x @ w2 + b2, 0.0)
    x = jnp.tanh(x @ w3 + b3)
    return x.reshape(x.shape[0], 3, IMAGE_SIZE, IMAGE_SIZE)


if __name__ == "__main__":
    key = jax.random.PRNGKey(0)
    k_noise, k_text, k_params = jax.random.split(key, 3)

    batch = 2
    noise = jax.random.normal(k_noise, (batch, LATENT_DIM), jnp.float32)
    text = jax.random.normal(k_text, (batch, TEXT_DIM), jnp.float32)
    params = init_params(k_params)

    # One-time param prep (bf16 cast, W1 split/pad) — outside the call path.
    prep = jax.tree_util.tree_map(jax.block_until_ready, prepare_params(params))

    out = generator_forward(noise, text, prep)
    out = jax.block_until_ready(out)

    assert out.shape == (batch, 3, IMAGE_SIZE, IMAGE_SIZE), out.shape
    ref = reference_forward(noise, text, params)
    # bf16 weights -> relaxed tolerance vs f32 reference (tanh-bounded output).
    assert jnp.allclose(out, ref, atol=2e-2, rtol=2e-2), (
        "mismatch vs reference: max abs err = "
        f"{float(jnp.max(jnp.abs(out - ref)))}")

    print("KERNEL_OK")
</pallas_src>

<mosaic_0001>
module attributes {stable_mosaic.version = 11 : i64} {
  func.func @_generator_kernel(%arg0: i32, %arg1: memref<8x128xbf16, #tpu.memory_space<vmem>>, %arg2: memref<8x512xbf16, #tpu.memory_space<vmem>>, %arg3: memref<128x256xbf16, #tpu.memory_space<vmem>>, %arg4: memref<512x256xbf16, #tpu.memory_space<vmem>>, %arg5: memref<1x256xf32, #tpu.memory_space<vmem>>, %arg6: memref<256x512xbf16, #tpu.memory_space<vmem>>, %arg7: memref<1x512xf32, #tpu.memory_space<vmem>>, %arg8: memref<512x768xbf16, #tpu.memory_space<vmem>>, %arg9: memref<1x768xf32, #tpu.memory_space<vmem>>, %arg10: memref<8x768xf32, #tpu.memory_space<vmem>>) attributes {dimension_semantics = [#tpu.dimension_semantics<parallel>], iteration_bounds = array<i64: 1>, scalar_prefetch = 0 : i64, scratch_operands = 0 : i64, tpu.core_type = #tpu.core_type<tc>, window_params = [{transform_indices = @transform_0, window_bounds = array<i64: 8, 128>}, {transform_indices = @transform_1, window_bounds = array<i64: 8, 512>}, {pipeline_mode = #tpu.pipeline_mode<synchronous>, transform_indices = @transform_2, window_bounds = array<i64: 128, 256>}, {pipeline_mode = #tpu.pipeline_mode<synchronous>, transform_indices = @transform_3, window_bounds = array<i64: 512, 256>}, {pipeline_mode = #tpu.pipeline_mode<synchronous>, transform_indices = @transform_4, window_bounds = array<i64: 1, 256>}, {pipeline_mode = #tpu.pipeline_mode<synchronous>, transform_indices = @transform_5, window_bounds = array<i64: 256, 512>}, {pipeline_mode = #tpu.pipeline_mode<synchronous>, transform_indices = @transform_6, window_bounds = array<i64: 1, 512>}, {pipeline_mode = #tpu.pipeline_mode<synchronous>, transform_indices = @transform_7, window_bounds = array<i64: 512, 768>}, {pipeline_mode = #tpu.pipeline_mode<synchronous>, transform_indices = @transform_8, window_bounds = array<i64: 1, 768>}, {transform_indices = @transform_9, window_bounds = array<i64: 8, 768>}]} {
    %c0 = arith.constant 0 : index
    %c0_0 = arith.constant 0 : index
    %0 = vector.load %arg1[%c0, %c0_0] : memref<8x128xbf16, #tpu.memory_space<vmem>>, vector<8x128xbf16>
    %c0_1 = arith.constant 0 : index
    %c0_2 = arith.constant 0 : index
    %1 = vector.load %arg3[%c0_1, %c0_2] : memref<128x256xbf16, #tpu.memory_space<vmem>>, vector<128x256xbf16>
    %cst = arith.constant dense<0.000000e+00> : vector<8x256xf32>
    %2 = tpu.matmul %0, %1, %cst {dimension_numbers = #tpu.dot_dimension_numbers<[1], [0], [0], [1], [0, 0, 1, 1], [], []>} : vector<8x128xbf16>, vector<128x256xbf16>, vector<8x256xf32> -> vector<8x256xf32>
    %c0_3 = arith.constant 0 : index
    %c0_4 = arith.constant 0 : index
    %3 = vector.load %arg2[%c0_3, %c0_4] : memref<8x512xbf16, #tpu.memory_space<vmem>>, vector<8x512xbf16>
    %c0_5 = arith.constant 0 : index
    %c0_6 = arith.constant 0 : index
    %4 = vector.load %arg4[%c0_5, %c0_6] : memref<512x256xbf16, #tpu.memory_space<vmem>>, vector<512x256xbf16>
    %cst_7 = arith.constant dense<0.000000e+00> : vector<8x256xf32>
    %5 = tpu.matmul %3, %4, %cst_7 {dimension_numbers = #tpu.dot_dimension_numbers<[1], [0], [0], [1], [0, 0, 1, 1], [], []>} : vector<8x512xbf16>, vector<512x256xbf16>, vector<8x256xf32> -> vector<8x256xf32>
    %6 = arith.addf %2, %5 : vector<8x256xf32>
    %c0_8 = arith.constant 0 : index
    %c0_9 = arith.constant 0 : index
    %7 = vector.load %arg5[%c0_8, %c0_9] : memref<1x256xf32, #tpu.memory_space<vmem>>, vector<1x256xf32>
    %8 = vector.broadcast %7 : vector<1x256xf32> to vector<8x256xf32>
    %9 = arith.addf %6, %8 : vector<8x256xf32>
    %cst_10 = arith.constant 0.000000e+00 : f32
    %10 = vector.broadcast %cst_10 : f32 to vector<8x256xf32>
    %11 = arith.maximumf %9, %10 : vector<8x256xf32>
    %12 = arith.truncf %11 : vector<8x256xf32> to vector<8x256xbf16>
    %c0_11 = arith.constant 0 : index
    %c0_12 = arith.constant 0 : index
    %13 = vector.load %arg6[%c0_11, %c0_12] : memref<256x512xbf16, #tpu.memory_space<vmem>>, vector<256x512xbf16>
    %cst_13 = arith.constant dense<0.000000e+00> : vector<8x512xf32>
    %14 = tpu.matmul %12, %13, %cst_13 {dimension_numbers = #tpu.dot_dimension_numbers<[1], [0], [0], [1], [0, 0, 1, 1], [], []>} : vector<8x256xbf16>, vector<256x512xbf16>, vector<8x512xf32> -> vector<8x512xf32>
    %c0_14 = arith.constant 0 : index
    %c0_15 = arith.constant 0 : index
    %15 = vector.load %arg7[%c0_14, %c0_15] : memref<1x512xf32, #tpu.memory_space<vmem>>, vector<1x512xf32>
    %16 = vector.broadcast %15 : vector<1x512xf32> to vector<8x512xf32>
    %17 = arith.addf %14, %16 : vector<8x512xf32>
    %cst_16 = arith.constant 0.000000e+00 : f32
    %18 = vector.broadcast %cst_16 : f32 to vector<8x512xf32>
    %19 = arith.maximumf %17, %18 : vector<8x512xf32>
    %20 = arith.truncf %19 : vector<8x512xf32> to vector<8x512xbf16>
    %c0_17 = arith.constant 0 : index
    %c0_18 = arith.constant 0 : index
    %21 = vector.load %arg8[%c0_17, %c0_18] : memref<512x768xbf16, #tpu.memory_space<vmem>>, vector<512x768xbf16>
    %cst_19 = arith.constant dense<0.000000e+00> : vector<8x768xf32>
    %22 = tpu.matmul %20, %21, %cst_19 {dimension_numbers = #tpu.dot_dimension_numbers<[1], [0], [0], [1], [0, 0, 1, 1], [], []>} : vector<8x512xbf16>, vector<512x768xbf16>, vector<8x768xf32> -> vector<8x768xf32>
    %c0_20 = arith.constant 0 : index
    %c0_21 = arith.constant 0 : index
    %23 = vector.load %arg9[%c0_20, %c0_21] : memref<1x768xf32, #tpu.memory_space<vmem>>, vector<1x768xf32>
    %24 = vector.broadcast %23 : vector<1x768xf32> to vector<8x768xf32>
    %25 = arith.addf %22, %24 : vector<8x768xf32>
    %26 = math.tanh %25 : vector<8x768xf32>
    %c0_22 = arith.constant 0 : index
    %c0_23 = arith.constant 0 : index
    %27 = vector.load %arg10[%c0_22, %c0_23] : memref<8x768xf32, #tpu.memory_space<vmem>>, vector<8x768xf32>
    tpu.vector_store %arg10[%c0_22, %c0_23], %26 {strides = array<i32>} : memref<8x768xf32, #tpu.memory_space<vmem>>, vector<8x768xf32>,
    return
  }
  func.func @transform_0(%arg0: i32) -> (i32, i32) {
    %c0_i32 = arith.constant 0 : i32
    %c0_i32_0 = arith.constant 0 : i32
    return %arg0, %c0_i32 : i32, i32
  }
  func.func @transform_1(%arg0: i32) -> (i32, i32) {
    %c0_i32 = arith.constant 0 : i32
    %c0_i32_0 = arith.constant 0 : i32
    return %arg0, %c0_i32 : i32, i32
  }
  func.func @transform_2(%arg0: i32) -> (i32, i32) {
    %c0_i32 = arith.constant 0 : i32
    %c0_i32_0 = arith.constant 0 : i32
    %c0_i32_1 = arith.constant 0 : i32
    return %c0_i32, %c0_i32_0 : i32, i32
  }
  func.func @transform_3(%arg0: i32) -> (i32, i32) {
    %c0_i32 = arith.constant 0 : i32
    %c0_i32_0 = arith.constant 0 : i32
    %c0_i32_1 = arith.constant 0 : i32
    return %c0_i32, %c0_i32_0 : i32, i32
  }
  func.func @transform_4(%arg0: i32) -> (i32, i32) {
    %c0_i32 = arith.constant 0 : i32
    %c0_i32_0 = arith.constant 0 : i32
    %c0_i32_1 = arith.constant 0 : i32
    return %c0_i32, %c0_i32_0 : i32, i32
  }
  func.func @transform_5(%arg0: i32) -> (i32, i32) {
    %c0_i32 = arith.constant 0 : i32
    %c0_i32_0 = arith.constant 0 : i32
    %c0_i32_1 = arith.constant 0 : i32
    return %c0_i32, %c0_i32_0 : i32, i32
  }
  func.func @transform_6(%arg0: i32) -> (i32, i32) {
    %c0_i32 = arith.constant 0 : i32
    %c0_i32_0 = arith.constant 0 : i32
    %c0_i32_1 = arith.constant 0 : i32
    return %c0_i32, %c0_i32_0 : i32, i32
  }
  func.func @transform_7(%arg0: i32) -> (i32, i32) {
    %c0_i32 = arith.constant 0 : i32
    %c0_i32_0 = arith.constant 0 : i32
    %c0_i32_1 = arith.constant 0 : i32
    return %c0_i32, %c0_i32_0 : i32, i32
  }
  func.func @transform_8(%arg0: i32) -> (i32, i32) {
    %c0_i32 = arith.constant 0 : i32
    %c0_i32_0 = arith.constant 0 : i32
    %c0_i32_1 = arith.constant 0 : i32
    return %c0_i32, %c0_i32_0 : i32, i32
  }
  func.func @transform_9(%arg0: i32) -> (i32, i32) {
    %c0_i32 = arith.constant 0 : i32
    %c0_i32_0 = arith.constant 0 : i32
    return %arg0, %c0_i32 : i32, i32
  }
}

</mosaic_0001>

<bundles_post_ra>
// kernel: generator_forward.1
= control target key start
LH: loop header
LB: loop body
LE: loop exit
PB: predicated region body
PF: predicated region fallthrough
CT: control target
= control target key end

     0   :  { %14 = vsyncpa [#allocation3], 0  ;;  %s3783_s0 = inlined_call_operand.vmem [shape: bf16[8,128], index: 0, kind: input, shape index: {}]   ;;  %s3784_s1 = inlined_call_operand.vmem [shape: bf16[8,512], index: 1, kind: input, shape index: {}]   ;;  %s3785_s2 = inlined_call_operand.hbm [shape: bf16[128,256], index: 2, kind: input, shape index: {}]   ;;  %s3786_s3 = inlined_call_operand.hbm [shape: bf16[512,256], index: 3, kind: input, shape index: {}]   ;;  %s3787_s4 = inlined_call_operand.vmem [shape: f32[1,256], index: 4, kind: input, shape index: {}]   ;;  %s3788_s5 = inlined_call_operand.hbm [shape: bf16[256,512], index: 5, kind: input, shape index: {}]   ;;  %s3789_s6 = inlined_call_operand.vmem [shape: f32[1,512], index: 6, kind: input, shape index: {}]   ;;  %s3790_s7 = inlined_call_operand.hbm [shape: bf16[512,768], index: 7, kind: input, shape index: {}]   ;;  %s3791_s8 = inlined_call_operand.vmem [shape: f32[1,768], index: 8, kind: input, shape index: {}]   ;;  %s3792_s9 = inlined_call_operand.vmem [shape: f32[8,768], index: 9, kind: output, shape index: {}]  }
   0x1   :  { %15 = vsyncpa [#allocation5], 0 }
   0x2   :  { %16 = vsyncpa [#allocation8], 0  ;;  %s3628_s30 = smov [#allocation4]   ;;  %s3629_s11 = smov [#allocation2]  }
   0x3   :  { %s38_s10 = sshll.u32 %s3628_s30, 4  ;;  %s26_s12 = sshll.u32 %s3629_s11, 4  ;;  %s39_s10 = int_to_ptr.vmem [resolvable:$true] %s38_s10  ;;  %s27_s12 = int_to_ptr.vmem [resolvable:$true] %s26_s12 }
   0x4   :  { %s3550_s13 = scalar_lea.vmem %s39_s10, 8192  ;;  %p3555_p1 = scmp.lt.s32.totalorder %s39_s10, %s39_s10 }
   0x5   :  { %p3551_p0 = scmp.ne.s32.totalorder %s39_s10, %s3550_s13  ;;  %p3556_p2 = scmp.lt.s32.totalorder %s3550_s13, %s3550_s13 }
   0x7   :  { %p3557_p3 = por %p3556_p2, %p3555_p1 }
   0x9   :  { %p3558_p4 = pnand %p3557_p3, %p3551_p0 }
   0xb   :  { %3561 = shalt.err (!%p3558_p4)
}
   0xc   :  { %s3630_s14 = smov 128   ;;  %s3631_s15 = smov 8  }
   0xd   :  { %44 = dma.hbm_to_vmem [thread:$0]  %s3786_s3, 8192, %s39_s10, [#allocation5], %s3630_s14, %s3630_s14, %s3631_s15  }
   0xe   :  { %s3570_s18 = scalar_lea.vmem %s27_s12, 2048  ;;  %p3575_p6 = scmp.lt.s32.totalorder %s27_s12, %s27_s12 }
   0xf   :  { %p3571_p5 = scmp.ne.s32.totalorder %s27_s12, %s3570_s18  ;;  %p3576_p7 = scmp.lt.s32.totalorder %s3570_s18, %s3570_s18 }
  0x11   :  { %p3577_p8 = por %p3576_p7, %p3575_p6 }
  0x13   :  { %p3578_p9 = pnand %p3577_p8, %p3571_p5 }
  0x15   :  { %3581 = shalt.err (!%p3578_p9)
}
  0x16   :  { %32 = dma.hbm_to_vmem [thread:$0]  %s3785_s2, 2048, %s27_s12, [#allocation3], %s3630_s14, %s3630_s14, %s3631_s15  }
  0x17   :  { %s3632_s21 = smov [#allocation6]  }
  0x18   :  { %s52_s22 = sshll.u32 %s3632_s21, 4  ;;  %s53_s22 = int_to_ptr.vmem [resolvable:$true] %s52_s22 }
  0x19   :  { %s3590_s23 = scalar_lea.vmem %s53_s22, 8192  ;;  %p3595_p11 = scmp.lt.s32.totalorder %s53_s22, %s53_s22 }
  0x1a   :  { %p3591_p10 = scmp.ne.s32.totalorder %s53_s22, %s3590_s23  ;;  %p3596_p12 = scmp.lt.s32.totalorder %s3590_s23, %s3590_s23 }
  0x1c   :  { %p3597_p13 = por %p3596_p12, %p3595_p11 }
  0x1e   :  { %p3598_p0 = pnand %p3597_p13, %p3591_p10 }
  0x20   :  { %3601 = shalt.err (!%p3598_p0)
}
  0x21   :  { %s3633_s3 = smov 256   ;;  %s3634_s24 = smov 16  }
  0x22   :  { %58 = dma.hbm_to_vmem [thread:$0]  %s3788_s5, 8192, %s53_s22, [#allocation5], %s3633_s3, %s3633_s3, %s3634_s24  }
  0x23   :  { %s3635_s27 = smov [#allocation7]  }
  0x24   :  { %s66_s28 = sshll.u32 %s3635_s27, 4  ;;  %s67_s28 = int_to_ptr.vmem [resolvable:$true] %s66_s28 }
  0x25   :  { %s3610_s2 = scalar_lea.vmem %s67_s28, 24576  ;;  %p3615_p2 = scmp.lt.s32.totalorder %s67_s28, %s67_s28 }
  0x26   :  { %p3611_p1 = scmp.ne.s32.totalorder %s67_s28, %s3610_s2  ;;  %p3616_p3 = scmp.lt.s32.totalorder %s3610_s2, %s3610_s2 }
  0x28   :  { %p3617_p4 = por %p3616_p3, %p3615_p2 }
  0x2a   :  { %p3618_p5 = pnand %p3617_p4, %p3611_p1 }
  0x2c   :  { %3621 = shalt.err (!%p3618_p5)
}
  0x2d   :  { %s3636_s29 = smov 384   ;;  %s3637_s30 = smov 24  }
  0x2e   :  { %72 = dma.hbm_to_vmem [thread:$0]  %s3790_s7, 24576, %s67_s28, [#allocation8], %s3636_s29, %s3636_s29, %s3637_s30  }
  0x2f   :  { %3622 = dma.done.wait [#allocation3], 2048  }
  0x30   :  { %3623 = vsyncadd [#allocation3], 4294965248 }
  0x31   :  { %3624 = dma.done.wait [#allocation5], 16384  }
  0x32   :  { %3625 = vsyncadd [#allocation5], 4294950912 }
  0x33   :  { %3626 = dma.done.wait [#allocation8], 24576  }
  0x34   :  { %3627 = vsyncadd [#allocation8], 4294942720  ;;  %v3022_v0 = vld [vmem:[#allocation4 + $0x74] ss:$8 sps:$4 sm:$0xff]   ;;  %v3026_v2 = vld [vmem:[#allocation4 + $0x70] ss:$8 sps:$4 sm:$0xff]  }
  0x35   :  { %v3024_v1 = vld [vmem:[#allocation4 + $0x174] ss:$8 sps:$4 sm:$0xff]   ;;  %505 = vmatprep.subr.bf16.mxu0 %v3022_v0  ;;  %v3027_v3 = vld [vmem:[#allocation4 + $0x170] ss:$8 sps:$4 sm:$0xff]   ;;  %v3028_v4 = vld [vmem:[#allocation4 + $0x64] ss:$8 sps:$4 sm:$0xff]  }
  0x36   :  { %546 = vmatprep.subr.bf16.mxu1 %v3024_v1  ;;  %506 = vmatpush1.bf16.msra.mxu0 %v3026_v2  ;;  %v3030_v5 = vld [vmem:[#allocation4 + $0x164] ss:$8 sps:$4 sm:$0xff]   ;;  %v3032_v6 = vld [vmem:[#allocation4 + $0x60] ss:$8 sps:$4 sm:$0xff]   ;;  %v3034_v8 = vld [vmem:[#allocation4 + $0x54] ss:$8 sps:$4 sm:$0xff]  }
  0x37   :  { %547 = vmatpush1.bf16.msra.mxu1 %v3027_v3  ;;  %507 = vmatprep.subr.bf16.mxu0 %v3028_v4  ;;  %v3033_v7 = vld [vmem:[#allocation4 + $0x160] ss:$8 sps:$4 sm:$0xff]   ;;  %v3036_v9 = vld [vmem:[#allocation4 + $0x154] ss:$8 sps:$4 sm:$0xff]   ;;  %v3038_v10 = vld [vmem:[#allocation4 + $0x50] ss:$8 sps:$4 sm:$0xff]  }
  0x38   :  { %548 = vmatprep.subr.bf16.mxu1 %v3030_v5  ;;  %v3039_v11 = vld [vmem:[#allocation4 + $0x150] ss:$8 sps:$4 sm:$0xff]   ;;  %v3040_v12 = vld [vmem:[#allocation4 + $0x44] ss:$8 sps:$4 sm:$0xff]   ;;  %v3044_v14 = vld [vmem:[#allocation4 + $0x40] ss:$8 sps:$4 sm:$0xff]  }
  0x39   :  { %v3042_v13 = vld [vmem:[#allocation4 + $0x144] ss:$8 sps:$4 sm:$0xff]   ;;  %v3045_v15 = vld [vmem:[#allocation4 + $0x140] ss:$8 sps:$4 sm:$0xff]   ;;  %v3046_v16 = vld [vmem:[#allocation4 + $0x34] ss:$8 sps:$4 sm:$0xff]  }
  0x3a   :  { %508 = vmatpush1.bf16.msra.mxu0 %v3032_v6  ;;  %v3048_v17 = vld [vmem:[#allocation4 + $0x134] ss:$8 sps:$4 sm:$0xff]   ;;  %v3050_v18 = vld [vmem:[#allocation4 + $0x30] ss:$8 sps:$4 sm:$0xff]   ;;  %v3052_v20 = vld [vmem:[#allocation4 + $0x24] ss:$8 sps:$4 sm:$0xff]  }
  0x3b   :  { %549 = vmatpush1.bf16.msra.mxu1 %v3033_v7  ;;  %509 = vmatprep.subr.bf16.mxu0 %v3034_v8  ;;  %v3051_v19 = vld [vmem:[#allocation4 + $0x130] ss:$8 sps:$4 sm:$0xff]   ;;  %v3054_v21 = vld [vmem:[#allocation4 + $0x124] ss:$8 sps:$4 sm:$0xff]   ;;  %v3056_v22 = vld [vmem:[#allocation4 + $0x20] ss:$8 sps:$4 sm:$0xff]  }
  0x3c   :  { %550 = vmatprep.subr.bf16.mxu1 %v3036_v9  ;;  %v3057_v23 = vld [vmem:[#allocation4 + $0x120] ss:$8 sps:$4 sm:$0xff]   ;;  %v3058_v24 = vld [vmem:[#allocation4 + $0x14] ss:$8 sps:$4 sm:$0xff]   ;;  %v3062_v26 = vld [vmem:[#allocation4 + $0x10] ss:$8 sps:$4 sm:$0xff]  }
  0x3d   :  { %v3060_v25 = vld [vmem:[#allocation4 + $0x114] ss:$8 sps:$4 sm:$0xff]   ;;  %v3063_v27 = vld [vmem:[#allocation4 + $0x110] ss:$8 sps:$4 sm:$0xff]   ;;  %v3064_v28 = vld [vmem:[#allocation4 + $0x4] ss:$8 sps:$4 sm:$0xff]  }
  0x3e   :  { %510 = vmatpush1.bf16.msra.mxu0 %v3038_v10  ;;  %v3066_v29 = vld [vmem:[#allocation4 + $0x104] ss:$8 sps:$4 sm:$0xff]   ;;  %v3068_v30 = vld [vmem:[#allocation4] ss:$8 sps:$4 sm:$0xff]   ;;  %v3070_v32 = vld [vmem:[#allocation4 + $0xf4] ss:$8 sps:$4 sm:$0xff]  }
  0x3f   :  { %551 = vmatpush1.bf16.msra.mxu1 %v3039_v11  ;;  %511 = vmatprep.subr.bf16.mxu0 %v3040_v12  ;;  %v3069_v31 = vld [vmem:[#allocation4 + $0x100] ss:$8 sps:$4 sm:$0xff]   ;;  %v3072_v33 = vld [vmem:[#allocation4 + $0x1f4] ss:$8 sps:$4 sm:$0xff]   ;;  %v3074_v34 = vld [vmem:[#allocation4 + $0xf0] ss:$8 sps:$4 sm:$0xff]  }
  0x40   :  { %552 = vmatprep.subr.bf16.mxu1 %v3042_v13  ;;  %v3075_v35 = vld [vmem:[#allocation4 + $0x1f0] ss:$8 sps:$4 sm:$0xff]   ;;  %v3076_v36 = vld [vmem:[#allocation4 + $0xe4] ss:$8 sps:$4 sm:$0xff]   ;;  %v3080_v38 = vld [vmem:[#allocation4 + $0xe0] ss:$8 sps:$4 sm:$0xff]  }
  0x41   :  { %v3078_v37 = vld [vmem:[#allocation4 + $0x1e4] ss:$8 sps:$4 sm:$0xff]   ;;  %v3081_v39 = vld [vmem:[#allocation4 + $0x1e0] ss:$8 sps:$4 sm:$0xff]   ;;  %v3082_v40 = vld [vmem:[#allocation4 + $0xd4] ss:$8 sps:$4 sm:$0xff]  }
  0x42   :  { %512 = vmatpush1.bf16.msra.mxu0 %v3044_v14  ;;  %v3084_v41 = vld [vmem:[#allocation4 + $0x1d4] ss:$8 sps:$4 sm:$0xff]   ;;  %v3086_v42 = vld [vmem:[#allocation4 + $0xd0] ss:$8 sps:$4 sm:$0xff]   ;;  %v3088_v44 = vld [vmem:[#allocation4 + $0xc4] ss:$8 sps:$4 sm:$0xff]  }
  0x43   :  { %553 = vmatpush1.bf16.msra.mxu1 %v3045_v15  ;;  %513 = vmatprep.subr.bf16.mxu0 %v3046_v16  ;;  %v3087_v43 = vld [vmem:[#allocation4 + $0x1d0] ss:$8 sps:$4 sm:$0xff]   ;;  %v3090_v45 = vld [vmem:[#allocation4 + $0x1c4] ss:$8 sps:$4 sm:$0xff]   ;;  %v3092_v49 = vld [vmem:[#allocation4 + $0xc0] ss:$8 sps:$4 sm:$0xff]  }
  0x44   :  { %554 = vmatprep.subr.bf16.mxu1 %v3048_v17  ;;  %v105_v46 = vld [vmem:[%s3784_s1] sm:$0xff]  ;;  %v106_v48 = vld [vmem:[%s3784_s1 + $0x8] sm:$0xff]  ;;  %v3094_v52 = vld [vmem:[#allocation4 + $0xb4] ss:$8 sps:$4 sm:$0xff]   ;;  %v3638_v15 = vmov 0  }
  0x45   :  { %v2672_v47 = vcombine.high %v105_v46, %v105_v46  ;;  %v3093_v50 = vld [vmem:[#allocation4 + $0x1c0] ss:$8 sps:$4 sm:$0xff]   ;;  %v2674_v51 = vcombine.high %v106_v48, %v106_v48  ;;  %v3096_v53 = vld [vmem:[#allocation4 + $0x1b4] ss:$8 sps:$4 sm:$0xff]   ;;  %v3098_v54 = vld [vmem:[#allocation4 + $0xb0] ss:$8 sps:$4 sm:$0xff]   ;;  %v2671_v6 = vcombine.low %v105_v46, %v105_v46  ;;  %v2673_v7 = vcombine.low %v106_v48, %v106_v48 }
  0x46   :  { %514 = vmatpush1.bf16.msra.mxu0 %v3050_v18  ;;  %v3099_v55 = vld [vmem:[#allocation4 + $0x1b0] ss:$8 sps:$4 sm:$0xff]   ;;  %v3100_v56 = vld [vmem:[#allocation4 + $0xa4] ss:$8 sps:$4 sm:$0xff]   ;;  %v3104_v58 = vld [vmem:[#allocation4 + $0xa0] ss:$8 sps:$4 sm:$0xff]  }
  0x47   :  { %555 = vmatpush1.bf16.msra.mxu1 %v3051_v19  ;;  %515 = vmatprep.subr.bf16.mxu0 %v3052_v20  ;;  %v3102_v57 = vld [vmem:[#allocation4 + $0x1a4] ss:$8 sps:$4 sm:$0xff]   ;;  %v3105_v59 = vld [vmem:[#allocation4 + $0x1a0] ss:$8 sps:$4 sm:$0xff]   ;;  %v3106_v60 = vld [vmem:[#allocation4 + $0x94] ss:$8 sps:$4 sm:$0xff]  }
  0x48   :  { %556 = vmatprep.subr.bf16.mxu1 %v3054_v21  ;;  %537 = vmatprep.mubr.bf16.mxu0 %v2672_v47  ;;  %v3108_v61 = vld [vmem:[#allocation4 + $0x194] ss:$8 sps:$4 sm:$0xff]   ;;  %v3110_v62 = vld [vmem:[#allocation4 + $0x90] ss:$8 sps:$4 sm:$0xff]   ;;  %v3112_v0 = vld [vmem:[#allocation4 + $0x84] ss:$8 sps:$4 sm:$0xff]  }
  0x49   :  { %578 = vmatprep.mubr.bf16.mxu1 %v2674_v51  ;;  %v3111_v63 = vld [vmem:[#allocation4 + $0x190] ss:$8 sps:$4 sm:$0xff]   ;;  %v3114_v1 = vld [vmem:[#allocation4 + $0x184] ss:$8 sps:$4 sm:$0xff]   ;;  %v3116_v2 = vld [vmem:[#allocation4 + $0x80] ss:$8 sps:$4 sm:$0xff]  }
  0x4a   :  { %516 = vmatpush1.bf16.msra.mxu0 %v3056_v22  ;;  %v3117_v3 = vld [vmem:[#allocation4 + $0x180] ss:$8 sps:$4 sm:$0xff]   ;;  %v3124_v4 = vld [vmem:[#allocation2 + $0x74] ss:$8 sps:$4 sm:$0xff]   ;;  %v3122_v8 = vld [vmem:[#allocation2 + $0x70] ss:$8 sps:$4 sm:$0xff]  }
  0x4b   :  { %557 = vmatpush1.bf16.msra.mxu1 %v3057_v23  ;;  %517 = vmatprep.subr.bf16.mxu0 %v3058_v24  ;;  %v3148_v5 = vld [vmem:[#allocation6 + $0xe4] ss:$16 sps:$4 sm:$0xff]   ;;  %v3146_v10 = vld [vmem:[#allocation6 + $0xe0] ss:$16 sps:$4 sm:$0xff]   ;;  %v3179_v47 = vld [vmem:[#allocation6 + $0x48] ss:$16 sps:$4 sm:$0xff]  }
  0x4c   :  { %558 = vmatprep.subr.bf16.mxu1 %v3060_v25  ;;  %v3127_v9 = vld [vmem:[#allocation2 + $0x64] ss:$8 sps:$4 sm:$0xff]   ;;  %v3125_v11 = vld [vmem:[#allocation2 + $0x60] ss:$8 sps:$4 sm:$0xff]   ;;  %v3130_v13 = vld [vmem:[#allocation2 + $0x54] ss:$8 sps:$4 sm:$0xff]  }
  0x4d   :  { %v3154_v12 = vld [vmem:[#allocation6 + $0xc4] ss:$16 sps:$4 sm:$0xff]   ;;  %v3152_v14 = vld [vmem:[#allocation6 + $0xc0] ss:$16 sps:$4 sm:$0xff]   ;;  %v3185_v51 = vld [vmem:[#allocation6 + $0x28] ss:$16 sps:$4 sm:$0xff]  }
  0x4e   :  { %518 = vmatpush1.bf16.msra.mxu0 %v3062_v26  ;;  %v3160_v16 = vld [vmem:[#allocation6 + $0xa4] ss:$16 sps:$4 sm:$0xff]   ;;  %v3128_v17 = vld [vmem:[#allocation2 + $0x50] ss:$8 sps:$4 sm:$0xff]   ;;  %v3131_v21 = vld [vmem:[#allocation2 + $0x40] ss:$8 sps:$4 sm:$0xff]  }
  0x4f   :  { %559 = vmatpush1.bf16.msra.mxu1 %v3063_v27  ;;  %519 = vmatprep.subr.bf16.mxu0 %v3064_v28  ;;  %v3133_v18 = vld [vmem:[#allocation2 + $0x44] ss:$8 sps:$4 sm:$0xff]   ;;  %v3158_v19 = vld [vmem:[#allocation6 + $0xa0] ss:$16 sps:$4 sm:$0xff]   ;;  %v3136_v22 = vld [vmem:[#allocation2 + $0x34] ss:$8 sps:$4 sm:$0xff]  }
  0x50   :  { %560 = vmatprep.subr.bf16.mxu1 %v3066_v29  ;;  %v3166_v20 = vld [vmem:[#allocation6 + $0x84] ss:$16 sps:$4 sm:$0xff]   ;;  %v3164_v23 = vld [vmem:[#allocation6 + $0x80] ss:$16 sps:$4 sm:$0xff]  }
  0x51   :  { %v3172_v24 = vld [vmem:[#allocation6 + $0x64] ss:$16 sps:$4 sm:$0xff]   ;;  %v3134_v25 = vld [vmem:[#allocation2 + $0x30] ss:$8 sps:$4 sm:$0xff]   ;;  %v3137_v28 = vld [vmem:[#allocation2 + $0x20] ss:$8 sps:$4 sm:$0xff]  }
  0x52   :  { %520 = vmatpush1.bf16.msra.mxu0 %v3068_v30  ;;  %v3139_v26 = vld [vmem:[#allocation2 + $0x24] ss:$8 sps:$4 sm:$0xff]   ;;  %v3170_v27 = vld [vmem:[#allocation6 + $0x60] ss:$16 sps:$4 sm:$0xff]   ;;  %v3142_v29 = vld [vmem:[#allocation2 + $0x14] ss:$8 sps:$4 sm:$0xff]  }
  0x53   :  { %561 = vmatpush1.bf16.msra.mxu1 %v3069_v31  ;;  %521 = vmatprep.subr.bf16.mxu0 %v3070_v32  ;;  %v3140_v30 = vld [vmem:[#allocation2 + $0x10] ss:$8 sps:$4 sm:$0xff]   ;;  %v3145_v31 = vld [vmem:[#allocation2 + $0x4] ss:$8 sps:$4 sm:$0xff]   ;;  %v3143_v32 = vld [vmem:[#allocation2] ss:$8 sps:$4 sm:$0xff]  }
  0x54   :  { %562 = vmatprep.subr.bf16.mxu1 %v3072_v33  ;;  %v3151_v33 = vld [vmem:[#allocation6 + $0xec] ss:$16 sps:$4 sm:$0xff]   ;;  %v3176_v46 = vld [vmem:[#allocation6 + $0x40] ss:$16 sps:$4 sm:$0xff]   ;;  %v3184_v48 = vld [vmem:[#allocation6 + $0x24] ss:$16 sps:$4 sm:$0xff]  }
  0x56   :  { %522 = vmatpush2.bf16.msra.mxu0 %v3074_v34  ;;  %v88_v34 = vld [vmem:[%s3783_s0] sm:$0xf] }
  0x57   :  { %563 = vmatpush2.bf16.msra.mxu1 %v3075_v35  ;;  %523 = vmatprep.subr.bf16.mxu0 %v3076_v36  ;;  %v3149_v35 = vld [vmem:[#allocation6 + $0xe8] ss:$16 sps:$4 sm:$0xff]   ;;  %v3157_v36 = vld [vmem:[#allocation6 + $0xcc] ss:$16 sps:$4 sm:$0xff]  }
  0x58   :  { %564 = vmatprep.subr.bf16.mxu1 %v3078_v37  ;;  %v3155_v37 = vld [vmem:[#allocation6 + $0xc8] ss:$16 sps:$4 sm:$0xff]  }
  0x5a   :  { %524 = vmatpush2.bf16.msra.mxu0 %v3080_v38  ;;  %v3163_v38 = vld [vmem:[#allocation6 + $0xac] ss:$16 sps:$4 sm:$0xff]  }
  0x5b   :  { %565 = vmatpush2.bf16.msra.mxu1 %v3081_v39  ;;  %525 = vmatprep.subr.bf16.mxu0 %v3082_v40  ;;  %v3161_v39 = vld [vmem:[#allocation6 + $0xa8] ss:$16 sps:$4 sm:$0xff]   ;;  %v3169_v40 = vld [vmem:[#allocation6 + $0x8c] ss:$16 sps:$4 sm:$0xff]  }
  0x5c   :  { %566 = vmatprep.subr.bf16.mxu1 %v3084_v41  ;;  %v3167_v41 = vld [vmem:[#allocation6 + $0x88] ss:$16 sps:$4 sm:$0xff]  }
  0x5e   :  { %526 = vmatpush2.bf16.msra.mxu0 %v3086_v42  ;;  %v3175_v42 = vld [vmem:[#allocation6 + $0x6c] ss:$16 sps:$4 sm:$0xff]  }
  0x5f   :  { %567 = vmatpush2.bf16.msra.mxu1 %v3087_v43  ;;  %527 = vmatprep.subr.bf16.mxu0 %v3088_v44  ;;  %v3173_v43 = vld [vmem:[#allocation6 + $0x68] ss:$16 sps:$4 sm:$0xff]   ;;  %v3178_v44 = vld [vmem:[#allocation6 + $0x44] ss:$16 sps:$4 sm:$0xff]  }
  0x60   :  { %568 = vmatprep.subr.bf16.mxu1 %v3090_v45  ;;  %v3181_v45 = vld [vmem:[#allocation6 + $0x4c] ss:$16 sps:$4 sm:$0xff]  }
  0x62   :  { %528 = vmatpush2.bf16.msra.mxu0 %v3092_v49  ;;  %v3187_v49 = vld [vmem:[#allocation6 + $0x2c] ss:$16 sps:$4 sm:$0xff]  }
  0x63   :  { %569 = vmatpush2.bf16.msra.mxu1 %v3093_v50  ;;  %529 = vmatprep.subr.bf16.mxu0 %v3094_v52  ;;  %v3182_v50 = vld [vmem:[#allocation6 + $0x20] ss:$16 sps:$4 sm:$0xff]  }
  0x64   :  { %570 = vmatprep.subr.bf16.mxu1 %v3096_v53  ;;  %v3188_v52 = vld [vmem:[#allocation6] ss:$16 sps:$4 sm:$0xff]   ;;  %v3190_v53 = vld [vmem:[#allocation6 + $0x4] ss:$16 sps:$4 sm:$0xff]  }
  0x66   :  { %530 = vmatpush2.bf16.msra.mxu0 %v3098_v54  ;;  %v3191_v54 = vld [vmem:[#allocation6 + $0x8] ss:$16 sps:$4 sm:$0xff]  }
  0x67   :  { %571 = vmatpush2.bf16.msra.mxu1 %v3099_v55  ;;  %531 = vmatprep.subr.bf16.mxu0 %v3100_v56  ;;  %v3193_v55 = vld [vmem:[#allocation6 + $0xc] ss:$16 sps:$4 sm:$0xff]   ;;  %v3196_v56 = vld [vmem:[#allocation6 + $0x1e4] ss:$16 sps:$4 sm:$0xff]  }
  0x68   :  { %572 = vmatprep.subr.bf16.mxu1 %v3102_v57  ;;  %v3199_v57 = vld [vmem:[#allocation6 + $0x1ec] ss:$16 sps:$4 sm:$0xff]  }
  0x6a   :  { %532 = vmatpush2.bf16.msra.mxu0 %v3104_v58  ;;  %v3194_v58 = vld [vmem:[#allocation6 + $0x1e0] ss:$16 sps:$4 sm:$0xff]  }
  0x6b   :  { %573 = vmatpush2.bf16.msra.mxu1 %v3105_v59  ;;  %533 = vmatprep.subr.bf16.mxu0 %v3106_v60  ;;  %v3197_v59 = vld [vmem:[#allocation6 + $0x1e8] ss:$16 sps:$4 sm:$0xff]   ;;  %v3202_v60 = vld [vmem:[#allocation6 + $0x1c4] ss:$16 sps:$4 sm:$0xff]  }
  0x6c   :  { %574 = vmatprep.subr.bf16.mxu1 %v3108_v61  ;;  %v3205_v61 = vld [vmem:[#allocation6 + $0x1cc] ss:$16 sps:$4 sm:$0xff]  }
  0x6e   :  { %534 = vmatpush2.bf16.msra.mxu0 %v3110_v62  ;;  %v3200_v62 = vld [vmem:[#allocation6 + $0x1c0] ss:$16 sps:$4 sm:$0xff]  }
  0x6f   :  { %575 = vmatpush2.bf16.msra.mxu1 %v3111_v63  ;;  %535 = vmatprep.subr.bf16.mxu0 %v3112_v0  ;;  %v3203_v63 = vld [vmem:[#allocation6 + $0x1c8] ss:$16 sps:$4 sm:$0xff]   ;;  %v3208_v0 = vld [vmem:[#allocation6 + $0x1a4] ss:$16 sps:$4 sm:$0xff]  }
  0x70   :  { %576 = vmatprep.subr.bf16.mxu1 %v3114_v1  ;;  %v3211_v1 = vld [vmem:[#allocation6 + $0x1ac] ss:$16 sps:$4 sm:$0xff]  }
  0x72   :  { %536 = vmatpush2.bf16.msra.mxu0 %v3116_v2  ;;  %v3206_v2 = vld [vmem:[#allocation6 + $0x1a0] ss:$16 sps:$4 sm:$0xff]  }
  0x73   :  { %577 = vmatpush2.bf16.msra.mxu1 %v3117_v3  ;;  %667 = vmatprep.subr.bf16.mxu0 %v3124_v4  ;;  %v3209_v3 = vld [vmem:[#allocation6 + $0x1a8] ss:$16 sps:$4 sm:$0xff]   ;;  %v3214_v4 = vld [vmem:[#allocation6 + $0x184] ss:$16 sps:$4 sm:$0xff]  }
  0x74   :  { %1132 = vmatprep.subr.bf16.mxu1 %v3148_v5  ;;  %v3217_v5 = vld [vmem:[#allocation6 + $0x18c] ss:$16 sps:$4 sm:$0xff]  }
  0x75   :  { %538 = vmatmul.mubr.bf16.vlgmr.msra.gmra.mxu0 %v2671_v6  ;;  %v3212_v6 = vld [vmem:[#allocation6 + $0x180] ss:$16 sps:$4 sm:$0xff]  }
  0x76   :  { %579 = vmatmul.mubr.bf16.vlgmr.msra.gmra.mxu1 %v2673_v7  ;;  %668 = vmatpush1.bf16.msra.mxu0 %v3122_v8  ;;  %v3215_v7 = vld [vmem:[#allocation6 + $0x188] ss:$16 sps:$4 sm:$0xff]   ;;  %v3220_v8 = vld [vmem:[#allocation6 + $0x164] ss:$16 sps:$4 sm:$0xff]  }
  0x77   :  { %699 = vmatprep.mubr.bf16.mxu0 %v3638_v15  ;;  %669 = vmatprep.subr.bf16.mxu0 %v3127_v9  ;;  %v3223_v9 = vld [vmem:[#allocation6 + $0x16c] ss:$16 sps:$4 sm:$0xff]   ;;  %v3227_v15 = vld [vmem:[#allocation6 + $0x148] ss:$16 sps:$4 sm:$0xff]  }
  0x78   :  { %1133 = vmatpush1.bf16.msra.mxu1 %v3146_v10  ;;  %v3218_v10 = vld [vmem:[#allocation6 + $0x160] ss:$16 sps:$4 sm:$0xff]  }
  0x79   :  { %1134 = vmatprep.subr.bf16.mxu1 %v3154_v12  ;;  %v3226_v12 = vld [vmem:[#allocation6 + $0x144] ss:$16 sps:$4 sm:$0xff]  }
  0x7a   :  { %670 = vmatpush1.bf16.msra.mxu0 %v3125_v11  ;;  %v3221_v11 = vld [vmem:[#allocation6 + $0x168] ss:$16 sps:$4 sm:$0xff]  }
  0x7b   :  { %671 = vmatprep.subr.bf16.mxu0 %v3130_v13  ;;  %v3229_v13 = vld [vmem:[#allocation6 + $0x14c] ss:$16 sps:$4 sm:$0xff]  }
  0x7c   :  { %1135 = vmatpush1.bf16.msra.mxu1 %v3152_v14  ;;  %v3224_v14 = vld [vmem:[#allocation6 + $0x140] ss:$16 sps:$4 sm:$0xff]  }
  0x7d   :  { %1136 = vmatprep.subr.bf16.mxu1 %v3160_v16  ;;  %v3232_v16 = vld [vmem:[#allocation6 + $0x124] ss:$16 sps:$4 sm:$0xff]  }
  0x7e   :  { %672 = vmatpush1.bf16.msra.mxu0 %v3128_v17  ;;  %v3235_v17 = vld [vmem:[#allocation6 + $0x12c] ss:$16 sps:$4 sm:$0xff]  }
  0x7f   :  { %673 = vmatprep.subr.bf16.mxu0 %v3133_v18  ;;  %v3230_v18 = vld [vmem:[#allocation6 + $0x120] ss:$16 sps:$4 sm:$0xff]  }
  0x80   :  { %1137 = vmatpush1.bf16.msra.mxu1 %v3158_v19  ;;  %v3233_v19 = vld [vmem:[#allocation6 + $0x128] ss:$16 sps:$4 sm:$0xff]  }
  0x81   :  { %1138 = vmatprep.subr.bf16.mxu1 %v3166_v20  ;;  %v3238_v20 = vld [vmem:[#allocation6 + $0x104] ss:$16 sps:$4 sm:$0xff]  }
  0x82   :  { %674 = vmatpush1.bf16.msra.mxu0 %v3131_v21  ;;  %v3241_v21 = vld [vmem:[#allocation6 + $0x10c] ss:$16 sps:$4 sm:$0xff]  }
  0x83   :  { %675 = vmatprep.subr.bf16.mxu0 %v3136_v22  ;;  %v3236_v22 = vld [vmem:[#allocation6 + $0x100] ss:$16 sps:$4 sm:$0xff]  }
  0x84   :  { %1139 = vmatpush1.bf16.msra.mxu1 %v3164_v23  ;;  %v3239_v23 = vld [vmem:[#allocation6 + $0x108] ss:$16 sps:$4 sm:$0xff]  }
  0x85   :  { %1140 = vmatprep.subr.bf16.mxu1 %v3172_v24  ;;  %v3244_v24 = vld [vmem:[#allocation7 + $0x154] ss:$24 sps:$4 sm:$0xff]  }
  0x86   :  { %676 = vmatpush1.bf16.msra.mxu0 %v3134_v25  ;;  %v3247_v25 = vld [vmem:[#allocation7 + $0x454] ss:$24 sps:$4 sm:$0xff]  }
  0x87   :  { %677 = vmatprep.subr.bf16.mxu0 %v3139_v26 }
  0x88   :  { %1141 = vmatpush1.bf16.msra.mxu1 %v3170_v27 }
  0x89   :  { %1142 = vmatprep.subr.bf16.mxu1 %v3178_v44 }
  0x8a   :  { %678 = vmatpush1.bf16.msra.mxu0 %v3137_v28 }
  0x8b   :  { %679 = vmatprep.subr.bf16.mxu0 %v3142_v29 }
  0x8c   :  { %1143 = vmatpush1.bf16.msra.mxu1 %v3176_v46 }
  0x8d   :  { %1144 = vmatprep.subr.bf16.mxu1 %v3184_v48 }
  0x8e   :  { %680 = vmatpush1.bf16.msra.mxu0 %v3140_v30 }
  0x8f   :  { %681 = vmatprep.subr.bf16.mxu0 %v3145_v31 }
  0x90   :  { %1145 = vmatpush1.bf16.msra.mxu1 %v3182_v50 }
  0x91   :  { %1146 = vmatprep.subr.bf16.mxu1 %v3190_v53 }
  0x92   :  { %682 = vmatpush1.bf16.msra.mxu0 %v3143_v32 }
  0x93   :  { %1173 = vmatprep.subr.bf16.mxu0 %v3151_v33 }
  0x94   :  { %1147 = vmatpush1.bf16.msra.mxu1 %v3188_v52 }
  0x95   :  { %700 = vmatmul.mubr.bf16.vlgmr.msra.gmra.mxu0 %v88_v34  ;;  %1148 = vmatprep.subr.bf16.mxu1 %v3196_v56  ;;  %v710_v34 = vlaneseq }
  0x96   :  { %1174 = vmatpush1.bf16.msra.mxu0 %v3149_v35 }
  0x97   :  { %1175 = vmatprep.subr.bf16.mxu0 %v3157_v36  ;;  %v3710_v35 = vshrl.u32 %v710_v34, 7  ;;  %v3313_v34 = vld [vmem:[#allocation7 + $0x544] ss:$24 sps:$4 sm:$0xff]  }
  0x98   :  { %1149 = vmatpush2.bf16.msra.mxu1 %v3194_v58  ;;  %v3253_v58 = vld [vmem:[#allocation7 + $0x424] ss:$24 sps:$4 sm:$0xff]  }
  0x99   :  { %1150 = vmatprep.subr.bf16.mxu1 %v3202_v60  ;;  %v3713_v36 = vsub.s32 0, %v3710_v35  ;;  %v3251_v60 = vld [vmem:[#allocation7 + $0x420] ss:$24 sps:$4 sm:$0xff]  }
  0x9a   :  { %1176 = vmatpush1.bf16.msra.mxu0 %v3155_v37  ;;  %v708_v37 = vld [vmem:[%s3787_s4] sm:$0x3] }
  0x9b   :  { %1177 = vmatprep.subr.bf16.mxu0 %v3163_v38  ;;  %v3719_v38 = vsub.s32 1, %v3710_v35 }
  0x9c   :  { %1151 = vmatpush2.bf16.msra.mxu1 %v3200_v62  ;;  %v3259_v62 = vld [vmem:[#allocation7 + $0x3f4] ss:$24 sps:$4 sm:$0xff]  }
  0x9d   :  { %1152 = vmatprep.subr.bf16.mxu1 %v3208_v0  ;;  %v717_v44 = vrot.slane %v708_v37, %v3719_v38  ;;  %v3257_v0 = vld [vmem:[#allocation7 + $0x3f0] ss:$24 sps:$4 sm:$0xff]  }
  0x9e   :  { %1178 = vmatpush1.bf16.msra.mxu0 %v3161_v39 }
  0x9f   :  { %1179 = vmatprep.subr.bf16.mxu0 %v3169_v40  ;;  %v713_v40 = vrot.slane %v708_v37, %v3713_v36  ;;  %v3308_v37 = vld [vmem:[#allocation7 + $0x240] ss:$24 sps:$4 sm:$0xff]  }
  0xa0   :  { %1153 = vmatpush2.bf16.msra.mxu1 %v3206_v2  ;;  %v3265_v2 = vld [vmem:[#allocation7 + $0x3c4] ss:$24 sps:$4 sm:$0xff]  }
  0xa1   :  { %1154 = vmatprep.subr.bf16.mxu1 %v3214_v4  ;;  %v3263_v4 = vld [vmem:[#allocation7 + $0x3c0] ss:$24 sps:$4 sm:$0xff]  }
  0xa2   :  { %1180 = vmatpush1.bf16.msra.mxu0 %v3167_v41 }
  0xa3   :  { %1181 = vmatprep.subr.bf16.mxu0 %v3175_v42 }
  0xa4   :  { %1155 = vmatpush2.bf16.msra.mxu1 %v3212_v6  ;;  %v3271_v6 = vld [vmem:[#allocation7 + $0x394] ss:$24 sps:$4 sm:$0xff]  }
  0xa5   :  { %1156 = vmatprep.subr.bf16.mxu1 %v3220_v8  ;;  %v3269_v8 = vld [vmem:[#allocation7 + $0x390] ss:$24 sps:$4 sm:$0xff]  }
  0xa6   :  { %1182 = vmatpush1.bf16.msra.mxu0 %v3173_v43 }
  0xa7   :  { %1183 = vmatprep.subr.bf16.mxu0 %v3181_v45 }
  0xa8   :  { %1157 = vmatpush2.bf16.msra.mxu1 %v3218_v10  ;;  %v3277_v10 = vld [vmem:[#allocation7 + $0x364] ss:$24 sps:$4 sm:$0xff]  }
  0xa9   :  { %1158 = vmatprep.subr.bf16.mxu1 %v3226_v12  ;;  %v3275_v12 = vld [vmem:[#allocation7 + $0x360] ss:$24 sps:$4 sm:$0xff]  }
  0xaa   :  { %1184 = vmatpush1.bf16.msra.mxu0 %v3179_v47 }
  0xab   :  { %1185 = vmatprep.subr.bf16.mxu0 %v3187_v49 }
  0xac   :  { %1159 = vmatpush2.bf16.msra.mxu1 %v3224_v14  ;;  %v3283_v14 = vld [vmem:[#allocation7 + $0x334] ss:$24 sps:$4 sm:$0xff]  }
  0xad   :  { %1160 = vmatprep.subr.bf16.mxu1 %v3232_v16  ;;  %v3281_v16 = vld [vmem:[#allocation7 + $0x330] ss:$24 sps:$4 sm:$0xff]  }
  0xae   :  { %1186 = vmatpush1.bf16.msra.mxu0 %v3185_v51 }
  0xaf   :  { %1187 = vmatprep.subr.bf16.mxu0 %v3193_v55  ;;  %v3245_v55 = vld [vmem:[#allocation7 + $0x450] ss:$24 sps:$4 sm:$0xff]  }
  0xb0   :  { %1161 = vmatpush2.bf16.msra.mxu1 %v3230_v18  ;;  %v3289_v18 = vld [vmem:[#allocation7 + $0x304] ss:$24 sps:$4 sm:$0xff]  }
  0xb1   :  { %1162 = vmatprep.subr.bf16.mxu1 %v3238_v20  ;;  %v3287_v20 = vld [vmem:[#allocation7 + $0x300] ss:$24 sps:$4 sm:$0xff]  }
  0xb2   :  { %1188 = vmatpush1.bf16.msra.mxu0 %v3191_v54  ;;  %v3242_v54 = vld [vmem:[#allocation7 + $0x150] ss:$24 sps:$4 sm:$0xff]  }
  0xb3   :  { %1189 = vmatprep.subr.bf16.mxu0 %v3199_v57  ;;  %v3250_v57 = vld [vmem:[#allocation7 + $0x124] ss:$24 sps:$4 sm:$0xff]  }
  0xb4   :  { %1163 = vmatpush2.bf16.msra.mxu1 %v3236_v22  ;;  %v3295_v22 = vld [vmem:[#allocation7 + $0x5d4] ss:$24 sps:$4 sm:$0xff]  }
  0xb5   :  { %2406 = vmatprep.subr.bf16.mxu1 %v3244_v24  ;;  %v3293_v24 = vld [vmem:[#allocation7 + $0x5d0] ss:$24 sps:$4 sm:$0xff]  }
  0xb6   :  { %1190 = vmatpush2.bf16.msra.mxu0 %v3197_v59  ;;  %v3248_v59 = vld [vmem:[#allocation7 + $0x120] ss:$24 sps:$4 sm:$0xff]  }
  0xb7   :  { %1191 = vmatprep.subr.bf16.mxu0 %v3205_v61  ;;  %v3256_v61 = vld [vmem:[#allocation7 + $0xf4] ss:$24 sps:$4 sm:$0xff]  }
  0xba   :  { %1192 = vmatpush2.bf16.msra.mxu0 %v3203_v63  ;;  %v3254_v63 = vld [vmem:[#allocation7 + $0xf0] ss:$24 sps:$4 sm:$0xff]  }
  0xbb   :  { %1193 = vmatprep.subr.bf16.mxu0 %v3211_v1  ;;  %v3262_v1 = vld [vmem:[#allocation7 + $0xc4] ss:$24 sps:$4 sm:$0xff]  }
  0xbe   :  { %1194 = vmatpush2.bf16.msra.mxu0 %v3209_v3  ;;  %v3260_v3 = vld [vmem:[#allocation7 + $0xc0] ss:$24 sps:$4 sm:$0xff]  }
  0xbf   :  { %1195 = vmatprep.subr.bf16.mxu0 %v3217_v5  ;;  %v3268_v5 = vld [vmem:[#allocation7 + $0x94] ss:$24 sps:$4 sm:$0xff]  }
  0xc2   :  { %1196 = vmatpush2.bf16.msra.mxu0 %v3215_v7  ;;  %v3266_v7 = vld [vmem:[#allocation7 + $0x90] ss:$24 sps:$4 sm:$0xff]  }
  0xc3   :  { %1197 = vmatprep.subr.bf16.mxu0 %v3223_v9  ;;  %v3274_v9 = vld [vmem:[#allocation7 + $0x64] ss:$24 sps:$4 sm:$0xff]  }
  0xc6   :  { %1198 = vmatpush2.bf16.msra.mxu0 %v3221_v11  ;;  %v3272_v11 = vld [vmem:[#allocation7 + $0x60] ss:$24 sps:$4 sm:$0xff]  }
  0xc7   :  { %1199 = vmatprep.subr.bf16.mxu0 %v3229_v13  ;;  %v3280_v13 = vld [vmem:[#allocation7 + $0x34] ss:$24 sps:$4 sm:$0xff]  }
  0xca   :  { %1200 = vmatpush2.bf16.msra.mxu0 %v3227_v15  ;;  %v3278_v15 = vld [vmem:[#allocation7 + $0x30] ss:$24 sps:$4 sm:$0xff]  }
  0xcb   :  { %1201 = vmatprep.subr.bf16.mxu0 %v3235_v17  ;;  %v3286_v17 = vld [vmem:[#allocation7 + $0x4] ss:$24 sps:$4 sm:$0xff]  }
  0xce   :  { %1202 = vmatpush2.bf16.msra.mxu0 %v3233_v19  ;;  %v3284_v19 = vld [vmem:[#allocation7] ss:$24 sps:$4 sm:$0xff]  }
  0xcf   :  { %1203 = vmatprep.subr.bf16.mxu0 %v3241_v21  ;;  %v3292_v21 = vld [vmem:[#allocation7 + $0x2d4] ss:$24 sps:$4 sm:$0xff]  }
  0xd2   :  { %1204 = vmatpush2.bf16.msra.mxu0 %v3239_v23  ;;  %v3290_v23 = vld [vmem:[#allocation7 + $0x2d0] ss:$24 sps:$4 sm:$0xff]  }
  0xd3   :  { %2447 = vmatprep.subr.bf16.mxu0 %v3247_v25  ;;  %v3298_v25 = vld [vmem:[#allocation7 + $0x2a4] ss:$24 sps:$4 sm:$0xff]  }
 0x135   :  { %v539_v26 = vpop.f32.mrf.mxu0 }
 0x136   :  { %v580_v27 = vpop.f32.mrf.mxu1 }
 0x137   :  { %v541_v28 = vpop.f32.mrf.mxu0  ;;  %v581_v39 = vadd.f32 %v580_v27, %v539_v26  ;;  %v3301_v26 = vld [vmem:[#allocation7 + $0x5a4] ss:$24 sps:$4 sm:$0xff]   ;;  %v3296_v27 = vld [vmem:[#allocation7 + $0x2a0] ss:$24 sps:$4 sm:$0xff]  }
 0x138   :  { %v582_v29 = vpop.f32.mrf.mxu1 }
 0x139   :  { %v543_v30 = vpop.f32.mrf.mxu0  ;;  %v583_v42 = vadd.f32 %v582_v29, %v541_v28  ;;  %v3299_v28 = vld [vmem:[#allocation7 + $0x5a0] ss:$24 sps:$4 sm:$0xff]   ;;  %v3304_v29 = vld [vmem:[#allocation7 + $0x274] ss:$24 sps:$4 sm:$0xff]  }
 0x13a   :  { %v584_v31 = vpop.f32.mrf.mxu1  ;;  %v3307_v30 = vld [vmem:[#allocation7 + $0x574] ss:$24 sps:$4 sm:$0xff]  }
 0x13b   :  { %v544_v32 = vpop.f32.mrf.mxu0  ;;  %v3302_v31 = vld [vmem:[#allocation7 + $0x270] ss:$24 sps:$4 sm:$0xff]  }
 0x13c   :  { %v585_v33 = vpop.f32.mrf.mxu1  ;;  %v3305_v32 = vld [vmem:[#allocation7 + $0x570] ss:$24 sps:$4 sm:$0xff]  }
 0x13d   :  { %v3310_v33 = vld [vmem:[#allocation7 + $0x244] ss:$24 sps:$4 sm:$0xff]  }
 0x155   :  { %v701_v41 = vpop.f32.mrf.mxu0 }
 0x156   :  { %v702_v43 = vadd.f32 %v701_v41, %v581_v39  ;;  %v3311_v39 = vld [vmem:[#allocation7 + $0x540] ss:$24 sps:$4 sm:$0xff]   ;;  %v3319_v41 = vld [vmem:[#allocation7 + $0x514] ss:$24 sps:$4 sm:$0xff]  }
 0x157   :  { %v703_v45 = vpop.f32.mrf.mxu0 }
 0x158   :  { %v720_v46 = vadd.f32 %v713_v40, %v702_v43  ;;  %v704_v47 = vadd.f32 %v703_v45, %v583_v42  ;;  %v3316_v40 = vld [vmem:[#allocation7 + $0x214] ss:$24 sps:$4 sm:$0xff]   ;;  %v3314_v42 = vld [vmem:[#allocation7 + $0x210] ss:$24 sps:$4 sm:$0xff]   ;;  %v3325_v45 = vld [vmem:[#allocation7 + $0x4e4] ss:$24 sps:$4 sm:$0xff]  }
 0x159   :  { %v705_v48 = vpop.f32.mrf.mxu0  ;;  %v3317_v43 = vld [vmem:[#allocation7 + $0x510] ss:$24 sps:$4 sm:$0xff]  }
 0x15a   :  { %v721_v49 = vadd.f32 %v717_v44, %v704_v47  ;;  %v722_v50 = vmax.f32 %v720_v46, 0.0  ;;  %v3322_v44 = vld [vmem:[#allocation7 + $0x1e4] ss:$24 sps:$4 sm:$0xff]   ;;  %v3320_v46 = vld [vmem:[#allocation7 + $0x1e0] ss:$24 sps:$4 sm:$0xff]  }
 0x15b   :  { %v706_v51 = vpop.f32.mrf.mxu0  ;;  %v3323_v47 = vld [vmem:[#allocation7 + $0x4e0] ss:$24 sps:$4 sm:$0xff]   ;;  %v3328_v48 = vld [vmem:[#allocation7 + $0x1b4] ss:$24 sps:$4 sm:$0xff]  }
 0x15c   :  { %v723_v52 = vmax.f32 %v721_v49, 0.0  ;;  %v724_v56 = vpack.c.bf16 %v722_v50, %v722_v50  ;;  %v3331_v49 = vld [vmem:[#allocation7 + $0x4b4] ss:$24 sps:$4 sm:$0xff]   ;;  %v3326_v50 = vld [vmem:[#allocation7 + $0x1b0] ss:$24 sps:$4 sm:$0xff]  }
 0x15d   :  { %v3329_v51 = vld [vmem:[#allocation7 + $0x4b0] ss:$24 sps:$4 sm:$0xff]  }
 0x15e   :  { %v725_v53 = vpack.c.bf16 %v723_v52, %v723_v52  ;;  %v3334_v52 = vld [vmem:[#allocation7 + $0x184] ss:$24 sps:$4 sm:$0xff]  }
 0x160   :  { %1164 = vmatprep.mubr.bf16.mxu1 %v725_v53  ;;  %1205 = vmatprep.mubr.bf16.mxu0 %v725_v53  ;;  %v3337_v53 = vld [vmem:[#allocation7 + $0x484] ss:$24 sps:$4 sm:$0xff]  }
 0x161   :  { %1165 = vmatmul.mubr.bf16.vlgmr.msra.gmra.mxu1 %v724_v56  ;;  %1206 = vmatmul.mubr.bf16.vlgmr.msra.gmra.mxu0 %v724_v56  ;;  %v3340_v56 = vld [vmem:[#allocation7 + $0x15c] ss:$24 sps:$4 sm:$0xff]  }
 0x162   :  { %2407 = vmatpush1.bf16.msra.mxu1 %v3242_v54  ;;  %2448 = vmatpush1.bf16.msra.mxu0 %v3245_v55  ;;  %v3332_v54 = vld [vmem:[#allocation7 + $0x180] ss:$24 sps:$4 sm:$0xff]  }
 0x163   :  { %2408 = vmatprep.subr.bf16.mxu1 %v3250_v57  ;;  %2449 = vmatprep.subr.bf16.mxu0 %v3253_v58  ;;  %v3335_v55 = vld [vmem:[#allocation7 + $0x480] ss:$24 sps:$4 sm:$0xff]   ;;  %v3343_v57 = vld [vmem:[#allocation7 + $0x45c] ss:$24 sps:$4 sm:$0xff]   ;;  %v802_v58 = vsub.s32 2, %v3710_v35 }
 0x166   :  { %2409 = vmatpush1.bf16.msra.mxu1 %v3248_v59  ;;  %2450 = vmatpush1.bf16.msra.mxu0 %v3251_v60  ;;  %v790_v59 = vld [vmem:[%s3789_s6] sm:$0xf]  ;;  %v806_v60 = vsub.s32 3, %v3710_v35 }
 0x167   :  { %2410 = vmatprep.subr.bf16.mxu1 %v3256_v61  ;;  %2451 = vmatprep.subr.bf16.mxu0 %v3259_v62  ;;  %v795_v61 = vrot.slane %v790_v59, %v3713_v36  ;;  %v803_v62 = vrot.slane %v790_v59, %v802_v58 }
 0x16a   :  { %2411 = vmatpush1.bf16.msra.mxu1 %v3254_v63  ;;  %2452 = vmatpush1.bf16.msra.mxu0 %v3257_v0  ;;  %v799_v63 = vrot.slane %v790_v59, %v3719_v38  ;;  %v807_v0 = vrot.slane %v790_v59, %v806_v60  ;;  %v3394_v59 = vld [vmem:[#allocation7 + $0x2ac] ss:$24 sps:$4 sm:$0xff]  }
 0x16b   :  { %2412 = vmatprep.subr.bf16.mxu1 %v3262_v1  ;;  %2453 = vmatprep.subr.bf16.mxu0 %v3265_v2 }
 0x16e   :  { %2413 = vmatpush1.bf16.msra.mxu1 %v3260_v3  ;;  %2454 = vmatpush1.bf16.msra.mxu0 %v3263_v4 }
 0x16f   :  { %2414 = vmatprep.subr.bf16.mxu1 %v3268_v5  ;;  %2455 = vmatprep.subr.bf16.mxu0 %v3271_v6 }
 0x172   :  { %2415 = vmatpush1.bf16.msra.mxu1 %v3266_v7  ;;  %2456 = vmatpush1.bf16.msra.mxu0 %v3269_v8 }
 0x173   :  { %2416 = vmatprep.subr.bf16.mxu1 %v3274_v9  ;;  %2457 = vmatprep.subr.bf16.mxu0 %v3277_v10 }
 0x176   :  { %2417 = vmatpush1.bf16.msra.mxu1 %v3272_v11  ;;  %2458 = vmatpush1.bf16.msra.mxu0 %v3275_v12 }
 0x177   :  { %2418 = vmatprep.subr.bf16.mxu1 %v3280_v13  ;;  %2459 = vmatprep.subr.bf16.mxu0 %v3283_v14 }
 0x17a   :  { %2419 = vmatpush1.bf16.msra.mxu1 %v3278_v15  ;;  %2460 = vmatpush1.bf16.msra.mxu0 %v3281_v16 }
 0x17b   :  { %2420 = vmatprep.subr.bf16.mxu1 %v3286_v17  ;;  %2461 = vmatprep.subr.bf16.mxu0 %v3289_v18 }
 0x17e   :  { %2421 = vmatpush1.bf16.msra.mxu1 %v3284_v19  ;;  %2462 = vmatpush1.bf16.msra.mxu0 %v3287_v20  ;;  %v3338_v19 = vld [vmem:[#allocation7 + $0x158] ss:$24 sps:$4 sm:$0xff]  }
 0x17f   :  { %2422 = vmatprep.subr.bf16.mxu1 %v3292_v21  ;;  %2463 = vmatprep.subr.bf16.mxu0 %v3295_v22  ;;  %v3341_v20 = vld [vmem:[#allocation7 + $0x458] ss:$24 sps:$4 sm:$0xff]  }
 0x182   :  { %2423 = vmatpush2.bf16.msra.mxu1 %v3290_v23  ;;  %2464 = vmatpush2.bf16.msra.mxu0 %v3293_v24  ;;  %v3346_v23 = vld [vmem:[#allocation7 + $0x12c] ss:$24 sps:$4 sm:$0xff]  }
 0x183   :  { %2424 = vmatprep.subr.bf16.mxu1 %v3298_v25  ;;  %2465 = vmatprep.subr.bf16.mxu0 %v3301_v26  ;;  %v3349_v24 = vld [vmem:[#allocation7 + $0x42c] ss:$24 sps:$4 sm:$0xff]   ;;  %v3344_v25 = vld [vmem:[#allocation7 + $0x128] ss:$24 sps:$4 sm:$0xff]  }
 0x184   :  { %v3347_v26 = vld [vmem:[#allocation7 + $0x428] ss:$24 sps:$4 sm:$0xff]  }
 0x186   :  { %2425 = vmatpush2.bf16.msra.mxu1 %v3296_v27  ;;  %2466 = vmatpush2.bf16.msra.mxu0 %v3299_v28  ;;  %v3352_v27 = vld [vmem:[#allocation7 + $0xfc] ss:$24 sps:$4 sm:$0xff]  }
 0x187   :  { %2426 = vmatprep.subr.bf16.mxu1 %v3304_v29  ;;  %2467 = vmatprep.subr.bf16.mxu0 %v3307_v30  ;;  %v3355_v28 = vld [vmem:[#allocation7 + $0x3fc] ss:$24 sps:$4 sm:$0xff]   ;;  %v3350_v29 = vld [vmem:[#allocation7 + $0xf8] ss:$24 sps:$4 sm:$0xff]  }
 0x188   :  { %v3353_v30 = vld [vmem:[#allocation7 + $0x3f8] ss:$24 sps:$4 sm:$0xff]  }
 0x18a   :  { %2427 = vmatpush2.bf16.msra.mxu1 %v3302_v31  ;;  %2468 = vmatpush2.bf16.msra.mxu0 %v3305_v32  ;;  %v3358_v31 = vld [vmem:[#allocation7 + $0xcc] ss:$24 sps:$4 sm:$0xff]  }
 0x18b   :  { %2428 = vmatprep.subr.bf16.mxu1 %v3310_v33  ;;  %2469 = vmatprep.subr.bf16.mxu0 %v3313_v34  ;;  %v3361_v32 = vld [vmem:[#allocation7 + $0x3cc] ss:$24 sps:$4 sm:$0xff]   ;;  %v3356_v33 = vld [vmem:[#allocation7 + $0xc8] ss:$24 sps:$4 sm:$0xff]  }
 0x18c   :  { %v3359_v34 = vld [vmem:[#allocation7 + $0x3c8] ss:$24 sps:$4 sm:$0xff]  }
 0x18e   :  { %2429 = vmatpush2.bf16.msra.mxu1 %v3308_v37  ;;  %2470 = vmatpush2.bf16.msra.mxu0 %v3311_v39  ;;  %v3364_v37 = vld [vmem:[#allocation7 + $0x9c] ss:$24 sps:$4 sm:$0xff]  }
 0x18f   :  { %2430 = vmatprep.subr.bf16.mxu1 %v3316_v40  ;;  %2471 = vmatprep.subr.bf16.mxu0 %v3319_v41  ;;  %v3367_v39 = vld [vmem:[#allocation7 + $0x39c] ss:$24 sps:$4 sm:$0xff]   ;;  %v3362_v40 = vld [vmem:[#allocation7 + $0x98] ss:$24 sps:$4 sm:$0xff]  }
 0x190   :  { %v3365_v41 = vld [vmem:[#allocation7 + $0x398] ss:$24 sps:$4 sm:$0xff]  }
 0x192   :  { %2431 = vmatpush2.bf16.msra.mxu1 %v3314_v42  ;;  %2472 = vmatpush2.bf16.msra.mxu0 %v3317_v43  ;;  %v3370_v42 = vld [vmem:[#allocation7 + $0x6c] ss:$24 sps:$4 sm:$0xff]  }
 0x193   :  { %2432 = vmatprep.subr.bf16.mxu1 %v3322_v44  ;;  %2473 = vmatprep.subr.bf16.mxu0 %v3325_v45  ;;  %v3373_v43 = vld [vmem:[#allocation7 + $0x36c] ss:$24 sps:$4 sm:$0xff]   ;;  %v3368_v44 = vld [vmem:[#allocation7 + $0x68] ss:$24 sps:$4 sm:$0xff]  }
 0x194   :  { %v3371_v45 = vld [vmem:[#allocation7 + $0x368] ss:$24 sps:$4 sm:$0xff]  }
 0x196   :  { %2433 = vmatpush2.bf16.msra.mxu1 %v3320_v46  ;;  %2474 = vmatpush2.bf16.msra.mxu0 %v3323_v47  ;;  %v3376_v46 = vld [vmem:[#allocation7 + $0x3c] ss:$24 sps:$4 sm:$0xff]  }
 0x197   :  { %2434 = vmatprep.subr.bf16.mxu1 %v3328_v48  ;;  %2475 = vmatprep.subr.bf16.mxu0 %v3331_v49  ;;  %v3379_v47 = vld [vmem:[#allocation7 + $0x33c] ss:$24 sps:$4 sm:$0xff]   ;;  %v3374_v48 = vld [vmem:[#allocation7 + $0x38] ss:$24 sps:$4 sm:$0xff]  }
 0x198   :  { %v3377_v49 = vld [vmem:[#allocation7 + $0x338] ss:$24 sps:$4 sm:$0xff]  }
 0x19a   :  { %2435 = vmatpush2.bf16.msra.mxu1 %v3326_v50  ;;  %2476 = vmatpush2.bf16.msra.mxu0 %v3329_v51  ;;  %v3382_v50 = vld [vmem:[#allocation7 + $0xc] ss:$24 sps:$4 sm:$0xff]  }
 0x19b   :  { %2436 = vmatprep.subr.bf16.mxu1 %v3334_v52  ;;  %2477 = vmatprep.subr.bf16.mxu0 %v3337_v53  ;;  %v3385_v51 = vld [vmem:[#allocation7 + $0x30c] ss:$24 sps:$4 sm:$0xff]   ;;  %v3380_v52 = vld [vmem:[#allocation7 + $0x8] ss:$24 sps:$4 sm:$0xff]  }
 0x19c   :  { %v3383_v53 = vld [vmem:[#allocation7 + $0x308] ss:$24 sps:$4 sm:$0xff]  }
 0x19e   :  { %2437 = vmatpush2.bf16.msra.mxu1 %v3332_v54  ;;  %2478 = vmatpush2.bf16.msra.mxu0 %v3335_v55  ;;  %v3388_v54 = vld [vmem:[#allocation7 + $0x2dc] ss:$24 sps:$4 sm:$0xff]  }
 0x19f   :  { %2488 = vmatprep.subr.bf16.mxu1 %v3340_v56  ;;  %2529 = vmatprep.subr.bf16.mxu0 %v3343_v57  ;;  %v3391_v55 = vld [vmem:[#allocation7 + $0x5dc] ss:$24 sps:$4 sm:$0xff]   ;;  %v3386_v56 = vld [vmem:[#allocation7 + $0x2d8] ss:$24 sps:$4 sm:$0xff]  }
 0x1a0   :  { %v3389_v57 = vld [vmem:[#allocation7 + $0x5d8] ss:$24 sps:$4 sm:$0xff]  }
 0x221   :  { %v1166_v1 = vpop.f32.mrf.mxu1  ;;  %v1207_v2 = vpop.f32.mrf.mxu0 }
 0x222   :  { %v1167_v3 = vadd.f32 %v1166_v1, %v795_v61  ;;  %v1208_v4 = vadd.f32 %v1207_v2, %v803_v62  ;;  %v3397_v61 = vld [vmem:[#allocation7 + $0x5ac] ss:$24 sps:$4 sm:$0xff]   ;;  %v3392_v62 = vld [vmem:[#allocation7 + $0x2a8] ss:$24 sps:$4 sm:$0xff]   ;;  %v3403_v1 = vld [vmem:[#allocation7 + $0x57c] ss:$24 sps:$4 sm:$0xff]  }
 0x223   :  { %v1168_v5 = vpop.f32.mrf.mxu1  ;;  %v1209_v6 = vpop.f32.mrf.mxu0  ;;  %v3398_v2 = vld [vmem:[#allocation7 + $0x278] ss:$24 sps:$4 sm:$0xff]  }
 0x224   :  { %v1169_v7 = vadd.f32 %v1168_v5, %v799_v63  ;;  %v1210_v8 = vadd.f32 %v1209_v6, %v807_v0  ;;  %v1214_v9 = vmax.f32 %v1167_v3, 0.0  ;;  %v1216_v10 = vmax.f32 %v1208_v4, 0.0  ;;  %v3395_v63 = vld [vmem:[#allocation7 + $0x5a8] ss:$24 sps:$4 sm:$0xff]   ;;  %v3400_v0 = vld [vmem:[#allocation7 + $0x27c] ss:$24 sps:$4 sm:$0xff]  }
 0x225   :  { %v1170_v11 = vpop.f32.mrf.mxu1  ;;  %v1211_v12 = vpop.f32.mrf.mxu0  ;;  %v3401_v3 = vld [vmem:[#allocation7 + $0x578] ss:$24 sps:$4 sm:$0xff]   ;;  %v3406_v4 = vld [vmem:[#allocation7 + $0x24c] ss:$24 sps:$4 sm:$0xff]   ;;  %v3404_v6 = vld [vmem:[#allocation7 + $0x248] ss:$24 sps:$4 sm:$0xff]  }
 0x226   :  { %v1215_v13 = vmax.f32 %v1169_v7, 0.0  ;;  %v1217_v14 = vmax.f32 %v1210_v8, 0.0  ;;  %v3738_v21 = vpack.c.bf16 %v1214_v9, %v1214_v9  ;;  %v3740_v22 = vpack.c.bf16 %v1216_v10, %v1216_v10  ;;  %v3409_v5 = vld [vmem:[#allocation7 + $0x54c] ss:$24 sps:$4 sm:$0xff]   ;;  %v3407_v7 = vld [vmem:[#allocation7 + $0x548] ss:$24 sps:$4 sm:$0xff]  }
 0x227   :  { %v1171_v15 = vpop.f32.mrf.mxu1  ;;  %v1212_v16 = vpop.f32.mrf.mxu0  ;;  %v3412_v8 = vld [vmem:[#allocation7 + $0x21c] ss:$24 sps:$4 sm:$0xff]   ;;  %v3410_v10 = vld [vmem:[#allocation7 + $0x218] ss:$24 sps:$4 sm:$0xff]   ;;  %v3418_v12 = vld [vmem:[#allocation7 + $0x1ec] ss:$24 sps:$4 sm:$0xff]  }
 0x228   :  { %v3734_v17 = vpack.c.bf16 %v1215_v13, %v1215_v13  ;;  %v3736_v18 = vpack.c.bf16 %v1217_v14, %v1217_v14  ;;  %v3415_v9 = vld [vmem:[#allocation7 + $0x51c] ss:$24 sps:$4 sm:$0xff]   ;;  %v3413_v11 = vld [vmem:[#allocation7 + $0x518] ss:$24 sps:$4 sm:$0xff]   ;;  %v3421_v13 = vld [vmem:[#allocation7 + $0x4ec] ss:$24 sps:$4 sm:$0xff]  }
 0x229   :  { %v3416_v14 = vld [vmem:[#allocation7 + $0x1e8] ss:$24 sps:$4 sm:$0xff]   ;;  %v3424_v16 = vld [vmem:[#allocation7 + $0x1bc] ss:$24 sps:$4 sm:$0xff]  }
 0x22a   :  { %2438 = vmatprep.mubr.bf16.mxu1 %v3734_v17  ;;  %2479 = vmatprep.mubr.bf16.mxu0 %v3736_v18  ;;  %v3419_v15 = vld [vmem:[#allocation7 + $0x4e8] ss:$24 sps:$4 sm:$0xff]  }
 0x22b   :  { %2439 = vmatmul.mubr.bf16.vlgmr.msra.gmra.mxu1 %v3738_v21  ;;  %2480 = vmatmul.mubr.bf16.vlgmr.msra.gmra.mxu0 %v3740_v22 }
 0x22c   :  { %2489 = vmatpush1.bf16.msra.mxu1 %v3338_v19  ;;  %2530 = vmatpush1.bf16.msra.mxu0 %v3341_v20  ;;  %v3427_v19 = vld [vmem:[#allocation7 + $0x4bc] ss:$24 sps:$4 sm:$0xff]   ;;  %v3422_v20 = vld [vmem:[#allocation7 + $0x1b8] ss:$24 sps:$4 sm:$0xff]  }
 0x22d   :  { %2520 = vmatprep.mubr.bf16.mxu1 %v3734_v17  ;;  %2561 = vmatprep.mubr.bf16.mxu0 %v3736_v18 }
 0x22e   :  { %2490 = vmatprep.subr.bf16.mxu1 %v3346_v23  ;;  %2531 = vmatprep.subr.bf16.mxu0 %v3349_v24  ;;  %v3425_v23 = vld [vmem:[#allocation7 + $0x4b8] ss:$24 sps:$4 sm:$0xff]   ;;  %v3430_v24 = vld [vmem:[#allocation7 + $0x18c] ss:$24 sps:$4 sm:$0xff]  }
 0x230   :  { %2491 = vmatpush1.bf16.msra.mxu1 %v3344_v25  ;;  %2532 = vmatpush1.bf16.msra.mxu0 %v3347_v26  ;;  %v3433_v25 = vld [vmem:[#allocation7 + $0x48c] ss:$24 sps:$4 sm:$0xff]   ;;  %v3428_v26 = vld [vmem:[#allocation7 + $0x188] ss:$24 sps:$4 sm:$0xff]  }
 0x231   :  { %2492 = vmatprep.subr.bf16.mxu1 %v3352_v27  ;;  %2533 = vmatprep.subr.bf16.mxu0 %v3355_v28  ;;  %v3431_v27 = vld [vmem:[#allocation7 + $0x488] ss:$24 sps:$4 sm:$0xff]   ;;  %v3436_v28 = vld [vmem:[#allocation7 + $0x164] ss:$24 sps:$4 sm:$0xff]  }
 0x234   :  { %2493 = vmatpush1.bf16.msra.mxu1 %v3350_v29  ;;  %2534 = vmatpush1.bf16.msra.mxu0 %v3353_v30  ;;  %v3439_v29 = vld [vmem:[#allocation7 + $0x464] ss:$24 sps:$4 sm:$0xff]   ;;  %v3434_v30 = vld [vmem:[#allocation7 + $0x160] ss:$24 sps:$4 sm:$0xff]  }
 0x235   :  { %2494 = vmatprep.subr.bf16.mxu1 %v3358_v31  ;;  %2535 = vmatprep.subr.bf16.mxu0 %v3361_v32  ;;  %v3437_v31 = vld [vmem:[#allocation7 + $0x460] ss:$24 sps:$4 sm:$0xff]   ;;  %v3442_v32 = vld [vmem:[#allocation7 + $0x134] ss:$24 sps:$4 sm:$0xff]  }
 0x238   :  { %2495 = vmatpush1.bf16.msra.mxu1 %v3356_v33  ;;  %2536 = vmatpush1.bf16.msra.mxu0 %v3359_v34  ;;  %v3445_v33 = vld [vmem:[#allocation7 + $0x434] ss:$24 sps:$4 sm:$0xff]   ;;  %v3440_v34 = vld [vmem:[#allocation7 + $0x130] ss:$24 sps:$4 sm:$0xff]  }
 0x239   :  { %2496 = vmatprep.subr.bf16.mxu1 %v3364_v37  ;;  %2537 = vmatprep.subr.bf16.mxu0 %v3367_v39  ;;  %v3443_v37 = vld [vmem:[#allocation7 + $0x430] ss:$24 sps:$4 sm:$0xff]   ;;  %v3448_v39 = vld [vmem:[#allocation7 + $0x104] ss:$24 sps:$4 sm:$0xff]  }
 0x23c   :  { %2497 = vmatpush1.bf16.msra.mxu1 %v3362_v40  ;;  %2538 = vmatpush1.bf16.msra.mxu0 %v3365_v41  ;;  %v3451_v40 = vld [vmem:[#allocation7 + $0x404] ss:$24 sps:$4 sm:$0xff]   ;;  %v3446_v41 = vld [vmem:[#allocation7 + $0x100] ss:$24 sps:$4 sm:$0xff]  }
 0x23d   :  { %2498 = vmatprep.subr.bf16.mxu1 %v3370_v42  ;;  %2539 = vmatprep.subr.bf16.mxu0 %v3373_v43  ;;  %v3449_v42 = vld [vmem:[#allocation7 + $0x400] ss:$24 sps:$4 sm:$0xff]   ;;  %v3454_v43 = vld [vmem:[#allocation7 + $0xd4] ss:$24 sps:$4 sm:$0xff]  }
 0x240   :  { %2499 = vmatpush1.bf16.msra.mxu1 %v3368_v44  ;;  %2540 = vmatpush1.bf16.msra.mxu0 %v3371_v45  ;;  %v3457_v44 = vld [vmem:[#allocation7 + $0x3d4] ss:$24 sps:$4 sm:$0xff]   ;;  %v3452_v45 = vld [vmem:[#allocation7 + $0xd0] ss:$24 sps:$4 sm:$0xff]  }
 0x241   :  { %2500 = vmatprep.subr.bf16.mxu1 %v3376_v46  ;;  %2541 = vmatprep.subr.bf16.mxu0 %v3379_v47  ;;  %v3460_v46 = vld [vmem:[#allocation7 + $0xa4] ss:$24 sps:$4 sm:$0xff]   ;;  %v3458_v47 = vld [vmem:[#allocation7 + $0xa0] ss:$24 sps:$4 sm:$0xff]  }
 0x244   :  { %2501 = vmatpush1.bf16.msra.mxu1 %v3374_v48  ;;  %2542 = vmatpush1.bf16.msra.mxu0 %v3377_v49  ;;  %v3461_v48 = vld [vmem:[#allocation7 + $0x3a0] ss:$24 sps:$4 sm:$0xff]   ;;  %v3466_v49 = vld [vmem:[#allocation7 + $0x74] ss:$24 sps:$4 sm:$0xff]  }
 0x245   :  { %2502 = vmatprep.subr.bf16.mxu1 %v3382_v50  ;;  %2543 = vmatprep.subr.bf16.mxu0 %v3385_v51  ;;  %v3469_v50 = vld [vmem:[#allocation7 + $0x374] ss:$24 sps:$4 sm:$0xff]   ;;  %v3464_v51 = vld [vmem:[#allocation7 + $0x70] ss:$24 sps:$4 sm:$0xff]  }
 0x248   :  { %2503 = vmatpush1.bf16.msra.mxu1 %v3380_v52  ;;  %2544 = vmatpush1.bf16.msra.mxu0 %v3383_v53  ;;  %v3467_v52 = vld [vmem:[#allocation7 + $0x370] ss:$24 sps:$4 sm:$0xff]   ;;  %v3472_v53 = vld [vmem:[#allocation7 + $0x44] ss:$24 sps:$4 sm:$0xff]  }
 0x249   :  { %2504 = vmatprep.subr.bf16.mxu1 %v3388_v54  ;;  %2545 = vmatprep.subr.bf16.mxu0 %v3391_v55  ;;  %v3475_v54 = vld [vmem:[#allocation7 + $0x344] ss:$24 sps:$4 sm:$0xff]   ;;  %v3470_v55 = vld [vmem:[#allocation7 + $0x40] ss:$24 sps:$4 sm:$0xff]  }
 0x24c   :  { %2505 = vmatpush2.bf16.msra.mxu1 %v3386_v56  ;;  %2546 = vmatpush2.bf16.msra.mxu0 %v3389_v57  ;;  %v3473_v56 = vld [vmem:[#allocation7 + $0x340] ss:$24 sps:$4 sm:$0xff]   ;;  %v3478_v57 = vld [vmem:[#allocation7 + $0x14] ss:$24 sps:$4 sm:$0xff]  }
 0x24d   :  { %2506 = vmatprep.subr.bf16.mxu1 %v3394_v59  ;;  %2547 = vmatprep.subr.bf16.mxu0 %v3397_v61  ;;  %v3481_v59 = vld [vmem:[#allocation7 + $0x314] ss:$24 sps:$4 sm:$0xff]   ;;  %v3476_v61 = vld [vmem:[#allocation7 + $0x10] ss:$24 sps:$4 sm:$0xff]  }
 0x250   :  { %2507 = vmatpush2.bf16.msra.mxu1 %v3392_v62  ;;  %2548 = vmatpush2.bf16.msra.mxu0 %v3395_v63  ;;  %v3479_v62 = vld [vmem:[#allocation7 + $0x310] ss:$24 sps:$4 sm:$0xff]   ;;  %v3484_v63 = vld [vmem:[#allocation7 + $0x2e4] ss:$24 sps:$4 sm:$0xff]  }
 0x251   :  { %2508 = vmatprep.subr.bf16.mxu1 %v3400_v0  ;;  %2549 = vmatprep.subr.bf16.mxu0 %v3403_v1  ;;  %v3487_v0 = vld [vmem:[#allocation7 + $0x5e4] ss:$24 sps:$4 sm:$0xff]   ;;  %v3482_v1 = vld [vmem:[#allocation7 + $0x2e0] ss:$24 sps:$4 sm:$0xff]  }
 0x254   :  { %2509 = vmatpush2.bf16.msra.mxu1 %v3398_v2  ;;  %2550 = vmatpush2.bf16.msra.mxu0 %v3401_v3  ;;  %v3485_v2 = vld [vmem:[#allocation7 + $0x5e0] ss:$24 sps:$4 sm:$0xff]   ;;  %v3490_v3 = vld [vmem:[#allocation7 + $0x2b4] ss:$24 sps:$4 sm:$0xff]  }
 0x255   :  { %2510 = vmatprep.subr.bf16.mxu1 %v3406_v4  ;;  %2551 = vmatprep.subr.bf16.mxu0 %v3409_v5  ;;  %v3493_v4 = vld [vmem:[#allocation7 + $0x5b4] ss:$24 sps:$4 sm:$0xff]   ;;  %v3488_v5 = vld [vmem:[#allocation7 + $0x2b0] ss:$24 sps:$4 sm:$0xff]  }
 0x258   :  { %2511 = vmatpush2.bf16.msra.mxu1 %v3404_v6  ;;  %2552 = vmatpush2.bf16.msra.mxu0 %v3407_v7  ;;  %v3491_v6 = vld [vmem:[#allocation7 + $0x5b0] ss:$24 sps:$4 sm:$0xff]   ;;  %v3496_v7 = vld [vmem:[#allocation7 + $0x284] ss:$24 sps:$4 sm:$0xff]  }
 0x259   :  { %2512 = vmatprep.subr.bf16.mxu1 %v3412_v8  ;;  %2553 = vmatprep.subr.bf16.mxu0 %v3415_v9  ;;  %v3499_v8 = vld [vmem:[#allocation7 + $0x584] ss:$24 sps:$4 sm:$0xff]   ;;  %v3494_v9 = vld [vmem:[#allocation7 + $0x280] ss:$24 sps:$4 sm:$0xff]  }
 0x25c   :  { %2513 = vmatpush2.bf16.msra.mxu1 %v3410_v10  ;;  %2554 = vmatpush2.bf16.msra.mxu0 %v3413_v11  ;;  %v3497_v10 = vld [vmem:[#allocation7 + $0x580] ss:$24 sps:$4 sm:$0xff]   ;;  %v3502_v11 = vld [vmem:[#allocation7 + $0x254] ss:$24 sps:$4 sm:$0xff]  }
 0x25d   :  { %2514 = vmatprep.subr.bf16.mxu1 %v3418_v12  ;;  %2555 = vmatprep.subr.bf16.mxu0 %v3421_v13  ;;  %v3505_v12 = vld [vmem:[#allocation7 + $0x554] ss:$24 sps:$4 sm:$0xff]   ;;  %v3500_v13 = vld [vmem:[#allocation7 + $0x250] ss:$24 sps:$4 sm:$0xff]  }
 0x260   :  { %2515 = vmatpush2.bf16.msra.mxu1 %v3416_v14  ;;  %2556 = vmatpush2.bf16.msra.mxu0 %v3419_v15  ;;  %v3503_v14 = vld [vmem:[#allocation7 + $0x550] ss:$24 sps:$4 sm:$0xff]   ;;  %v3508_v15 = vld [vmem:[#allocation7 + $0x224] ss:$24 sps:$4 sm:$0xff]  }
 0x261   :  { %2516 = vmatprep.subr.bf16.mxu1 %v3424_v16  ;;  %2557 = vmatprep.subr.bf16.mxu0 %v3427_v19  ;;  %v3511_v16 = vld [vmem:[#allocation7 + $0x524] ss:$24 sps:$4 sm:$0xff]   ;;  %v3506_v19 = vld [vmem:[#allocation7 + $0x220] ss:$24 sps:$4 sm:$0xff]  }
 0x264   :  { %2517 = vmatpush2.bf16.msra.mxu1 %v3422_v20  ;;  %2558 = vmatpush2.bf16.msra.mxu0 %v3425_v23  ;;  %v3509_v20 = vld [vmem:[#allocation7 + $0x520] ss:$24 sps:$4 sm:$0xff]   ;;  %v3514_v23 = vld [vmem:[#allocation7 + $0x1f4] ss:$24 sps:$4 sm:$0xff]  }
 0x265   :  { %2518 = vmatprep.subr.bf16.mxu1 %v3430_v24  ;;  %2559 = vmatprep.subr.bf16.mxu0 %v3433_v25  ;;  %v3517_v24 = vld [vmem:[#allocation7 + $0x4f4] ss:$24 sps:$4 sm:$0xff]   ;;  %v3512_v25 = vld [vmem:[#allocation7 + $0x1f0] ss:$24 sps:$4 sm:$0xff]  }
 0x268   :  { %2519 = vmatpush2.bf16.msra.mxu1 %v3428_v26  ;;  %2560 = vmatpush2.bf16.msra.mxu0 %v3431_v27  ;;  %v3515_v26 = vld [vmem:[#allocation7 + $0x4f0] ss:$24 sps:$4 sm:$0xff]   ;;  %v3520_v27 = vld [vmem:[#allocation7 + $0x1c4] ss:$24 sps:$4 sm:$0xff]  }
 0x269   :  { %2570 = vmatprep.subr.bf16.mxu1 %v3436_v28  ;;  %2611 = vmatprep.subr.bf16.mxu0 %v3439_v29  ;;  %v3523_v28 = vld [vmem:[#allocation7 + $0x4c4] ss:$24 sps:$4 sm:$0xff]   ;;  %v3518_v29 = vld [vmem:[#allocation7 + $0x1c0] ss:$24 sps:$4 sm:$0xff]  }
 0x26b   :  { %2521 = vmatmul.mubr.bf16.vlgmr.msra.gmra.mxu1 %v3738_v21  ;;  %2562 = vmatmul.mubr.bf16.vlgmr.msra.gmra.mxu0 %v3740_v22 }
 0x26c   :  { %2571 = vmatpush1.bf16.msra.mxu1 %v3434_v30  ;;  %2602 = vmatprep.mubr.bf16.mxu1 %v3734_v17  ;;  %v3455_v17 = vld [vmem:[#allocation7 + $0x3d0] ss:$24 sps:$4 sm:$0xff]   ;;  %v3521_v30 = vld [vmem:[#allocation7 + $0x4c0] ss:$24 sps:$4 sm:$0xff]  }
 0x26d   :  { %2612 = vmatpush1.bf16.msra.mxu0 %v3437_v31  ;;  %2643 = vmatprep.mubr.bf16.mxu0 %v3736_v18  ;;  %v3463_v18 = vld [vmem:[#allocation7 + $0x3a4] ss:$24 sps:$4 sm:$0xff]   ;;  %v3526_v31 = vld [vmem:[#allocation7 + $0x194] ss:$24 sps:$4 sm:$0xff]  }
 0x26e   :  { %2572 = vmatprep.subr.bf16.mxu1 %v3442_v32  ;;  %2613 = vmatprep.subr.bf16.mxu0 %v3445_v33  ;;  %v3529_v32 = vld [vmem:[#allocation7 + $0x494] ss:$24 sps:$4 sm:$0xff]   ;;  %v3524_v33 = vld [vmem:[#allocation7 + $0x190] ss:$24 sps:$4 sm:$0xff]  }
 0x270   :  { %2573 = vmatpush1.bf16.msra.mxu1 %v3440_v34  ;;  %v3527_v34 = vld [vmem:[#allocation7 + $0x490] ss:$24 sps:$4 sm:$0xff]  }
 0x271   :  { %2614 = vmatpush1.bf16.msra.mxu0 %v3443_v37  ;;  %2574 = vmatprep.subr.bf16.mxu1 %v3448_v39  ;;  %v1414_v37 = vld [vmem:[%s3791_s8] sm:$0x3f] }
 0x272   :  { %2615 = vmatprep.subr.bf16.mxu0 %v3451_v40  ;;  %v1419_v39 = vrot.slane %v1414_v37, %v3713_v36  ;;  %v1423_v40 = vrot.slane %v1414_v37, %v3719_v38  ;;  %v1427_v38 = vrot.slane %v1414_v37, %v802_v58 }
 0x274   :  { %2575 = vmatpush1.bf16.msra.mxu1 %v3446_v41 }
 0x275   :  { %2616 = vmatpush1.bf16.msra.mxu0 %v3449_v42  ;;  %2576 = vmatprep.subr.bf16.mxu1 %v3454_v43 }
 0x276   :  { %2617 = vmatprep.subr.bf16.mxu0 %v3457_v44 }
 0x278   :  { %2577 = vmatpush1.bf16.msra.mxu1 %v3452_v45 }
 0x279   :  { %2618 = vmatpush1.bf16.msra.mxu0 %v3455_v17  ;;  %2578 = vmatprep.subr.bf16.mxu1 %v3460_v46 }
 0x27a   :  { %2619 = vmatprep.subr.bf16.mxu0 %v3463_v18 }
 0x27c   :  { %2579 = vmatpush1.bf16.msra.mxu1 %v3458_v47 }
 0x27d   :  { %2620 = vmatpush1.bf16.msra.mxu0 %v3461_v48  ;;  %2580 = vmatprep.subr.bf16.mxu1 %v3466_v49 }
 0x27e   :  { %2621 = vmatprep.subr.bf16.mxu0 %v3469_v50  ;;  %v1431_v50 = vrot.slane %v1414_v37, %v806_v60  ;;  %v1434_v60 = vsub.s32 4, %v3710_v35 }
 0x280   :  { %2581 = vmatpush1.bf16.msra.mxu1 %v3464_v51 }
 0x281   :  { %2622 = vmatpush1.bf16.msra.mxu0 %v3467_v52  ;;  %2582 = vmatprep.subr.bf16.mxu1 %v3472_v53 }
 0x282   :  { %2623 = vmatprep.subr.bf16.mxu0 %v3475_v54 }
 0x284   :  { %2583 = vmatpush1.bf16.msra.mxu1 %v3470_v55 }
 0x285   :  { %2624 = vmatpush1.bf16.msra.mxu0 %v3473_v56  ;;  %2584 = vmatprep.subr.bf16.mxu1 %v3478_v57 }
 0x286   :  { %2625 = vmatprep.subr.bf16.mxu0 %v3481_v59 }
 0x288   :  { %2585 = vmatpush1.bf16.msra.mxu1 %v3476_v61 }
 0x289   :  { %2626 = vmatpush1.bf16.msra.mxu0 %v3479_v62  ;;  %2586 = vmatprep.subr.bf16.mxu1 %v3484_v63 }
 0x28a   :  { %2627 = vmatprep.subr.bf16.mxu0 %v3487_v0 }
 0x28c   :  { %2587 = vmatpush2.bf16.msra.mxu1 %v3482_v1 }
 0x28d   :  { %2628 = vmatpush2.bf16.msra.mxu0 %v3485_v2  ;;  %2588 = vmatprep.subr.bf16.mxu1 %v3490_v3  ;;  %v1438_v2 = vsub.s32 5, %v3710_v35  ;;  %v1435_v3 = vrot.slane %v1414_v37, %v1434_v60 }
 0x28e   :  { %2629 = vmatprep.subr.bf16.mxu0 %v3493_v4 }
 0x28f   :  { %v1439_v4 = vrot.slane %v1414_v37, %v1438_v2 }
 0x290   :  { %2589 = vmatpush2.bf16.msra.mxu1 %v3488_v5 }
 0x291   :  { %2630 = vmatpush2.bf16.msra.mxu0 %v3491_v6  ;;  %2590 = vmatprep.subr.bf16.mxu1 %v3496_v7 }
 0x292   :  { %2631 = vmatprep.subr.bf16.mxu0 %v3499_v8 }
 0x294   :  { %2591 = vmatpush2.bf16.msra.mxu1 %v3494_v9 }
 0x295   :  { %2632 = vmatpush2.bf16.msra.mxu0 %v3497_v10  ;;  %2592 = vmatprep.subr.bf16.mxu1 %v3502_v11 }
 0x296   :  { %2633 = vmatprep.subr.bf16.mxu0 %v3505_v12 }
 0x298   :  { %2593 = vmatpush2.bf16.msra.mxu1 %v3500_v13 }
 0x299   :  { %2634 = vmatpush2.bf16.msra.mxu0 %v3503_v14  ;;  %2594 = vmatprep.subr.bf16.mxu1 %v3508_v15 }
 0x29a   :  { %2635 = vmatprep.subr.bf16.mxu0 %v3511_v16 }
 0x29c   :  { %2595 = vmatpush2.bf16.msra.mxu1 %v3506_v19 }
 0x29d   :  { %2636 = vmatpush2.bf16.msra.mxu0 %v3509_v20  ;;  %2596 = vmatprep.subr.bf16.mxu1 %v3514_v23 }
 0x29e   :  { %2637 = vmatprep.subr.bf16.mxu0 %v3517_v24 }
 0x2a0   :  { %2597 = vmatpush2.bf16.msra.mxu1 %v3512_v25 }
 0x2a1   :  { %2638 = vmatpush2.bf16.msra.mxu0 %v3515_v26  ;;  %2598 = vmatprep.subr.bf16.mxu1 %v3520_v27 }
 0x2a2   :  { %2639 = vmatprep.subr.bf16.mxu0 %v3523_v28 }
 0x2a4   :  { %2599 = vmatpush2.bf16.msra.mxu1 %v3518_v29 }
 0x2a5   :  { %2640 = vmatpush2.bf16.msra.mxu0 %v3521_v30  ;;  %2600 = vmatprep.subr.bf16.mxu1 %v3526_v31 }
 0x2a6   :  { %2641 = vmatprep.subr.bf16.mxu0 %v3529_v32 }
 0x2a8   :  { %2601 = vmatpush2.bf16.msra.mxu1 %v3524_v33 }
 0x2a9   :  { %2642 = vmatpush2.bf16.msra.mxu0 %v3527_v34 }
 0x2ab   :  { %2603 = vmatmul.mubr.bf16.vlgmr.msra.gmra.mxu1 %v3738_v21 }
 0x2ac   :  { %2644 = vmatmul.mubr.bf16.vlgmr.msra.gmra.mxu0 %v3740_v22 }
 0x2eb   :  { %v2440_v41 = vpop.f32.mrf.mxu1  ;;  %v2481_v42 = vpop.f32.mrf.mxu0 }
 0x2ec   :  { %v2441_v43 = vadd.f32 %v2440_v41, %v1419_v39 }
 0x2ed   :  { %v2442_v44 = vpop.f32.mrf.mxu1  ;;  %v2483_v45 = vpop.f32.mrf.mxu0 }
 0x2ee   :  { %v2482_v17 = vadd.f32 %v2481_v42, %v2441_v43  ;;  %v2443_v46 = vadd.f32 %v2442_v44, %v1423_v40 }
 0x2ef   :  { %v2444_v18 = vpop.f32.mrf.mxu1  ;;  %v2485_v47 = vpop.f32.mrf.mxu0 }
 0x2f0   :  { %3530 = vtanh.f32 %v2482_v17  ;;  %v2484_v21 = vadd.f32 %v2483_v45, %v2443_v46 }
 0x2f1   :  { %v2445_v22 = vpop.f32.mrf.mxu1  ;;  %v2486_v48 = vpop.f32.mrf.mxu0 }
 0x2f2   :  { %3532 = vtanh.f32 %v2484_v21 }
 0x2fd   :  { %v3531_v49 = vpop.eup %3530 }
 0x2fe   :  { %2658 = vst [vmem:[%s3792_s9] sm:$0xff] %v3531_v49 }
 0x2ff   :  { %v3533_v36 = vpop.eup %3532 }
 0x300   :  { %2659 = vst [vmem:[%s3792_s9 + $0x8] sm:$0xff] %v3533_v36 }
 0x32b   :  { %v2522_v51 = vpop.f32.mrf.mxu1  ;;  %v2563_v52 = vpop.f32.mrf.mxu0 }
 0x32c   :  { %v2523_v53 = vadd.f32 %v2522_v51, %v1427_v38 }
 0x32d   :  { %v2524_v54 = vpop.f32.mrf.mxu1  ;;  %v2565_v55 = vpop.f32.mrf.mxu0 }
 0x32e   :  { %v2564_v56 = vadd.f32 %v2563_v52, %v2523_v53  ;;  %v2525_v57 = vadd.f32 %v2524_v54, %v1431_v50 }
 0x32f   :  { %v2526_v59 = vpop.f32.mrf.mxu1  ;;  %v2567_v61 = vpop.f32.mrf.mxu0 }
 0x330   :  { %3534 = vtanh.f32 %v2564_v56  ;;  %v2566_v62 = vadd.f32 %v2565_v55, %v2525_v57 }
 0x331   :  { %v2527_v63 = vpop.f32.mrf.mxu1  ;;  %v2568_v0 = vpop.f32.mrf.mxu0 }
 0x332   :  { %3536 = vtanh.f32 %v2566_v62 }
 0x33d   :  { %v3535_v1 = vpop.eup %3534 }
 0x33e   :  { %2660 = vst [vmem:[%s3792_s9 + $0x10] sm:$0xff] %v3535_v1 }
 0x33f   :  { %v3537_v58 = vpop.eup %3536 }
 0x340   :  { %2661 = vst [vmem:[%s3792_s9 + $0x18] sm:$0xff] %v3537_v58 }
 0x36b   :  { %v2604_v5 = vpop.f32.mrf.mxu1 }
 0x36c   :  { %v2605_v6 = vadd.f32 %v2604_v5, %v1435_v3  ;;  %v2645_v7 = vpop.f32.mrf.mxu0 }
 0x36d   :  { %v2606_v8 = vpop.f32.mrf.mxu1 }
 0x36e   :  { %v2646_v9 = vadd.f32 %v2645_v7, %v2605_v6  ;;  %v2607_v10 = vadd.f32 %v2606_v8, %v1439_v4  ;;  %v2647_v11 = vpop.f32.mrf.mxu0 }
 0x36f   :  { %v2608_v12 = vpop.f32.mrf.mxu1 }
 0x370   :  { %3538 = vtanh.f32 %v2646_v9  ;;  %v2648_v13 = vadd.f32 %v2647_v11, %v2607_v10  ;;  %v2649_v14 = vpop.f32.mrf.mxu0 }
 0x371   :  { %v2609_v15 = vpop.f32.mrf.mxu1 }
 0x372   :  { %3540 = vtanh.f32 %v2648_v13  ;;  %v2650_v16 = vpop.f32.mrf.mxu0 }
 0x37d   :  { %v3539_v19 = vpop.eup %3538 }
 0x37e   :  { %2662 = vst [vmem:[%s3792_s9 + $0x20] sm:$0xff] %v3539_v19 }
 0x37f   :  { %v3541_v35 = vpop.eup %3540 }
 0x380   :  { %2663 = vst [vmem:[%s3792_s9 + $0x28] sm:$0xff] %v3541_v35 }
 0x381   :  { %2668 = vsyncpa [#allocation3], 1 }
 0x382   :  { %2669 = vsyncpa [#allocation5], 1 }
 0x383   :  { %2670 = vsyncpa [#allocation8], 1 }

</bundles_post_ra>
